<compile_context>
chip_gen: v5e
topology: v5e:2x2
jax: 0.10.0
libtpu: 0.0.40
codegen_flags: <defaults>
</compile_context>

<pallas_src>
import jax
import jax.numpy as jnp
from jax.experimental import pallas as pl
from jax.experimental.pallas import tpu as pltpu

NEG_SLOPE = 0.01  # PyTorch nn.LeakyReLU default negative_slope


def _leaky_relu(x):
    # max-form: single VALU max instead of cmp + select (numerically identical).
    return jnp.maximum(x, NEG_SLOPE * x)


def _critic_kernel(x_ref,
                   w1_ref, b1_ref,
                   w2_ref, b2_ref,
                   w3_ref, b3_ref,
                   w4_ref, b4_ref,
                   w5_ref, b5_ref,
                   o_ref):
    x = x_ref[...].astype(jnp.bfloat16)

    def layer(h_bf16, w_ref, b_ref):
        acc = jnp.dot(h_bf16, w_ref[...], preferred_element_type=jnp.float32)
        # bf16 epilogue: one cast, then bias-add + LeakyReLU in bf16, feed MXU.
        hb = acc.astype(jnp.bfloat16) + b_ref[...]
        return _leaky_relu(hb)

    h = layer(x, w1_ref, b1_ref)        # (TB, 1024)
    h = layer(h, w2_ref, b2_ref)        # (TB, 512)
    h = layer(h, w3_ref, b3_ref)        # (TB, 256)
    h = layer(h, w4_ref, b4_ref)        # (TB, 128)

    # Final Linear(128, 1): VPU multiply + lane reduction in f32.
    w5 = w5_ref[...].astype(jnp.float32)                        # (1, 128)
    out = jnp.sum(h.astype(jnp.float32) * w5, axis=-1, keepdims=True)
    out = out + b5_ref[...]                                     # (TB, 1)
    o_ref[...] = out.astype(o_ref.dtype)


def prepare_params(params):
    """params: list of (W, b), W shaped (in, out) f32 (PyTorch weights pre-transposed).

    Returns the flat operand list the kernel expects (bf16 weights/biases for
    layers 1-4, f32 bias for the value head)."""
    (w1, b1), (w2, b2), (w3, b3), (w4, b4), (w5, b5) = params
    wbf = lambda a: a.astype(jnp.bfloat16)
    bbf = lambda b: b.reshape(1, -1).astype(jnp.bfloat16)
    return [
        wbf(w1), bbf(b1),               # (S+A, 1024), (1, 1024)
        wbf(w2), bbf(b2),               # (1024, 512)
        wbf(w3), bbf(b3),               # (512, 256)
        wbf(w4), bbf(b4),               # (256, 128)
        wbf(w5.T),                      # (1, 128)
        b5.reshape(1, 1).astype(jnp.float32),
    ]


def _round_up(x, m):
    return -(-x // m) * m


@jax.jit
def critic_forward(state, action, flat_params):
    B = state.shape[0]
    # Wrapper-side concat: only (S+A)*4 = 128 B/row, lets layer 1 be one matmul.
    x = jnp.concatenate([state, action], axis=1)
    F_in = x.shape[1]

    # Balanced batch tiling: nb >= 2 when B > 256 (dual-TC on v7x), TB up to 512.
    if B <= 256:
        nb = 1
        TB = max(8, _round_up(B, 8))
    else:
        nb = max(2, pl.cdiv(B, 512))
        TB = _round_up(pl.cdiv(B, nb), 8)
    Bp = nb * TB
    if Bp != B:
        x = jnp.pad(x, ((0, Bp - B), (0, 0)))

    (w1, b1, w2, b2, w3, b3, w4, b4, w5t, b5) = flat_params
    consts = (w1, b1, w2, b2, w3, b3, w4, b4, w5t, b5)

    def const_spec(a):
        # Whole array, same block every grid step -> stays VMEM-resident.
        return pl.BlockSpec(a.shape, lambda i: (0, 0))

    flops = 2 * Bp * (F_in * 1024 + 1024 * 512 + 512 * 256 + 256 * 128 + 128)
    bytes_accessed = (x.size * x.dtype.itemsize
                      + sum(a.size * a.dtype.itemsize for a in consts)
                      + Bp * 4)

    out = pl.pallas_call(
        _critic_kernel,
        out_shape=jax.ShapeDtypeStruct((Bp, 1), jnp.float32),
        grid=(nb,),
        in_specs=[pl.BlockSpec((TB, F_in), lambda i: (i, 0))]
                 + [const_spec(a) for a in consts],
        out_specs=pl.BlockSpec((TB, 1), lambda i: (i, 0)),
        compiler_params=pltpu.CompilerParams(
            dimension_semantics=("parallel",),
            vmem_limit_bytes=32 << 20,
        ),
        cost_estimate=pl.CostEstimate(
            flops=flops, transcendentals=0, bytes_accessed=bytes_accessed),
    )(x, *consts)
    return out[:B]


def init_params(key, state_dim, action_dim):
    """Deterministic init mimicking PyTorch nn.Linear default U(-1/sqrt(fan_in), ...)."""
    dims = [state_dim + action_dim, 1024, 512, 256, 128, 1]
    params = []
    for i in range(len(dims) - 1):
        fan_in, fan_out = dims[i], dims[i + 1]
        key, kw, kb = jax.random.split(key, 3)
        bound = 1.0 / jnp.sqrt(fan_in)
        w = jax.random.uniform(kw, (fan_in, fan_out), jnp.float32, -bound, bound)
        b = jax.random.uniform(kb, (fan_out,), jnp.float32, -bound, bound)
        params.append((w, b))
    return params


def reference_forward(state, action, params):
    """Pure-JAX reference mirroring the kernel numerics (bf16 weights/activations,
    f32 MXU accumulation, bf16 epilogue, f32 value head)."""
    (w1, b1), (w2, b2), (w3, b3), (w4, b4), (w5, b5) = params
    h = jnp.concatenate([state, action], axis=1).astype(jnp.bfloat16)
    for (w, b) in ((w1, b1), (w2, b2), (w3, b3), (w4, b4)):
        acc = jnp.dot(h, w.astype(jnp.bfloat16),
                      preferred_element_type=jnp.float32)
        hb = acc.astype(jnp.bfloat16) + b.astype(jnp.bfloat16).reshape(1, -1)
        h = jnp.maximum(hb, NEG_SLOPE * hb)
    w5_q = w5.astype(jnp.bfloat16).astype(jnp.float32)          # (128, 1)
    out = jnp.sum(h.astype(jnp.float32) * w5_q.T, axis=-1, keepdims=True)
    return out + b5


if __name__ == "__main__":
    key = jax.random.PRNGKey(0)
    state_dim, action_dim, batch = 24, 8, 8

    kp, ks, ka = jax.random.split(key, 3)
    params = init_params(kp, state_dim, action_dim)
    flat_params = prepare_params(params)

    state = jax.random.normal(ks, (batch, state_dim), jnp.float32)
    action = jax.random.normal(ka, (batch, action_dim), jnp.float32)

    out = jax.block_until_ready(critic_forward(state, action, flat_params))
    ref = reference_forward(state, action, params)
    assert out.shape == (batch, 1), out.shape
    assert jnp.allclose(out, ref, atol=2e-3, rtol=2e-3), (
        f"max abs err {jnp.max(jnp.abs(out - ref))}")

    # Exercise the multi-tile + balanced-padding path (B=300 -> 2 tiles of 152).
    kb2 = jax.random.PRNGKey(1)
    ks2, ka2 = jax.random.split(kb2)
    state2 = jax.random.normal(ks2, (300, state_dim), jnp.float32)
    action2 = jax.random.normal(ka2, (300, action_dim), jnp.float32)
    out2 = jax.block_until_ready(critic_forward(state2, action2, flat_params))
    ref2 = reference_forward(state2, action2, params)
    assert out2.shape == (300, 1), out2.shape
    assert jnp.allclose(out2, ref2, atol=2e-3, rtol=2e-3), (
        f"max abs err {jnp.max(jnp.abs(out2 - ref2))}")

    print("KERNEL_OK")
</pallas_src>

<mosaic_0001>
module attributes {stable_mosaic.version = 11 : i64} {
  func.func @_critic_kernel(%arg0: i32, %arg1: memref<8x32xf32, #tpu.memory_space<vmem>>, %arg2: memref<32x1024xbf16, #tpu.memory_space<vmem>>, %arg3: memref<1x1024xbf16, #tpu.memory_space<vmem>>, %arg4: memref<1024x512xbf16, #tpu.memory_space<vmem>>, %arg5: memref<1x512xbf16, #tpu.memory_space<vmem>>, %arg6: memref<512x256xbf16, #tpu.memory_space<vmem>>, %arg7: memref<1x256xbf16, #tpu.memory_space<vmem>>, %arg8: memref<256x128xbf16, #tpu.memory_space<vmem>>, %arg9: memref<1x128xbf16, #tpu.memory_space<vmem>>, %arg10: memref<1x128xbf16, #tpu.memory_space<vmem>>, %arg11: memref<1x1xf32, #tpu.memory_space<vmem>>, %arg12: memref<8x1xf32, #tpu.memory_space<vmem>>) attributes {dimension_semantics = [#tpu.dimension_semantics<parallel>], iteration_bounds = array<i64: 1>, scalar_prefetch = 0 : i64, scratch_operands = 0 : i64, tpu.core_type = #tpu.core_type<tc>, window_params = [{transform_indices = @transform_0, window_bounds = array<i64: 8, 32>}, {pipeline_mode = #tpu.pipeline_mode<synchronous>, transform_indices = @transform_1, window_bounds = array<i64: 32, 1024>}, {pipeline_mode = #tpu.pipeline_mode<synchronous>, transform_indices = @transform_2, window_bounds = array<i64: 1, 1024>}, {pipeline_mode = #tpu.pipeline_mode<synchronous>, transform_indices = @transform_3, window_bounds = array<i64: 1024, 512>}, {pipeline_mode = #tpu.pipeline_mode<synchronous>, transform_indices = @transform_4, window_bounds = array<i64: 1, 512>}, {pipeline_mode = #tpu.pipeline_mode<synchronous>, transform_indices = @transform_5, window_bounds = array<i64: 512, 256>}, {pipeline_mode = #tpu.pipeline_mode<synchronous>, transform_indices = @transform_6, window_bounds = array<i64: 1, 256>}, {pipeline_mode = #tpu.pipeline_mode<synchronous>, transform_indices = @transform_7, window_bounds = array<i64: 256, 128>}, {pipeline_mode = #tpu.pipeline_mode<synchronous>, transform_indices = @transform_8, window_bounds = array<i64: 1, 128>}, {pipeline_mode = #tpu.pipeline_mode<synchronous>, transform_indices = @transform_9, window_bounds = array<i64: 1, 128>}, {pipeline_mode = #tpu.pipeline_mode<synchronous>, transform_indices = @transform_10, window_bounds = array<i64: 1, 1>}, {transform_indices = @transform_11, window_bounds = array<i64: 8, 1>}]} {
    %c0 = arith.constant 0 : index
    %c0_0 = arith.constant 0 : index
    %0 = vector.load %arg1[%c0, %c0_0] : memref<8x32xf32, #tpu.memory_space<vmem>>, vector<8x32xf32>
    %1 = arith.truncf %0 : vector<8x32xf32> to vector<8x32xbf16>
    %c0_1 = arith.constant 0 : index
    %c0_2 = arith.constant 0 : index
    %2 = vector.load %arg2[%c0_1, %c0_2] : memref<32x1024xbf16, #tpu.memory_space<vmem>>, vector<32x1024xbf16>
    %cst = arith.constant dense<0.000000e+00> : vector<8x1024xf32>
    %3 = tpu.matmul %1, %2, %cst {dimension_numbers = #tpu.dot_dimension_numbers<[1], [0], [0], [1], [0, 0, 1, 1], [], []>} : vector<8x32xbf16>, vector<32x1024xbf16>, vector<8x1024xf32> -> vector<8x1024xf32>
    %4 = arith.truncf %3 : vector<8x1024xf32> to vector<8x1024xbf16>
    %c0_3 = arith.constant 0 : index
    %c0_4 = arith.constant 0 : index
    %5 = vector.load %arg3[%c0_3, %c0_4] : memref<1x1024xbf16, #tpu.memory_space<vmem>>, vector<1x1024xbf16>
    %6 = vector.broadcast %5 : vector<1x1024xbf16> to vector<8x1024xbf16>
    %7 = arith.addf %4, %6 : vector<8x1024xbf16>
    %cst_5 = arith.constant 1.000980e-02 : bf16
    %8 = vector.broadcast %cst_5 : bf16 to vector<8x1024xbf16>
    %9 = arith.mulf %8, %7 : vector<8x1024xbf16>
    %10 = arith.maximumf %7, %9 : vector<8x1024xbf16>
    %c0_6 = arith.constant 0 : index
    %c0_7 = arith.constant 0 : index
    %11 = vector.load %arg4[%c0_6, %c0_7] : memref<1024x512xbf16, #tpu.memory_space<vmem>>, vector<1024x512xbf16>
    %cst_8 = arith.constant dense<0.000000e+00> : vector<8x512xf32>
    %12 = tpu.matmul %10, %11, %cst_8 {dimension_numbers = #tpu.dot_dimension_numbers<[1], [0], [0], [1], [0, 0, 1, 1], [], []>} : vector<8x1024xbf16>, vector<1024x512xbf16>, vector<8x512xf32> -> vector<8x512xf32>
    %13 = arith.truncf %12 : vector<8x512xf32> to vector<8x512xbf16>
    %c0_9 = arith.constant 0 : index
    %c0_10 = arith.constant 0 : index
    %14 = vector.load %arg5[%c0_9, %c0_10] : memref<1x512xbf16, #tpu.memory_space<vmem>>, vector<1x512xbf16>
    %15 = vector.broadcast %14 : vector<1x512xbf16> to vector<8x512xbf16>
    %16 = arith.addf %13, %15 : vector<8x512xbf16>
    %cst_11 = arith.constant 1.000980e-02 : bf16
    %17 = vector.broadcast %cst_11 : bf16 to vector<8x512xbf16>
    %18 = arith.mulf %17, %16 : vector<8x512xbf16>
    %19 = arith.maximumf %16, %18 : vector<8x512xbf16>
    %c0_12 = arith.constant 0 : index
    %c0_13 = arith.constant 0 : index
    %20 = vector.load %arg6[%c0_12, %c0_13] : memref<512x256xbf16, #tpu.memory_space<vmem>>, vector<512x256xbf16>
    %cst_14 = arith.constant dense<0.000000e+00> : vector<8x256xf32>
    %21 = tpu.matmul %19, %20, %cst_14 {dimension_numbers = #tpu.dot_dimension_numbers<[1], [0], [0], [1], [0, 0, 1, 1], [], []>} : vector<8x512xbf16>, vector<512x256xbf16>, vector<8x256xf32> -> vector<8x256xf32>
    %22 = arith.truncf %21 : vector<8x256xf32> to vector<8x256xbf16>
    %c0_15 = arith.constant 0 : index
    %c0_16 = arith.constant 0 : index
    %23 = vector.load %arg7[%c0_15, %c0_16] : memref<1x256xbf16, #tpu.memory_space<vmem>>, vector<1x256xbf16>
    %24 = vector.broadcast %23 : vector<1x256xbf16> to vector<8x256xbf16>
    %25 = arith.addf %22, %24 : vector<8x256xbf16>
    %cst_17 = arith.constant 1.000980e-02 : bf16
    %26 = vector.broadcast %cst_17 : bf16 to vector<8x256xbf16>
    %27 = arith.mulf %26, %25 : vector<8x256xbf16>
    %28 = arith.maximumf %25, %27 : vector<8x256xbf16>
    %c0_18 = arith.constant 0 : index
    %c0_19 = arith.constant 0 : index
    %29 = vector.load %arg8[%c0_18, %c0_19] : memref<256x128xbf16, #tpu.memory_space<vmem>>, vector<256x128xbf16>
    %cst_20 = arith.constant dense<0.000000e+00> : vector<8x128xf32>
    %30 = tpu.matmul %28, %29, %cst_20 {dimension_numbers = #tpu.dot_dimension_numbers<[1], [0], [0], [1], [0, 0, 1, 1], [], []>} : vector<8x256xbf16>, vector<256x128xbf16>, vector<8x128xf32> -> vector<8x128xf32>
    %31 = arith.truncf %30 : vector<8x128xf32> to vector<8x128xbf16>
    %c0_21 = arith.constant 0 : index
    %c0_22 = arith.constant 0 : index
    %32 = vector.load %arg9[%c0_21, %c0_22] : memref<1x128xbf16, #tpu.memory_space<vmem>>, vector<1x128xbf16>
    %33 = vector.broadcast %32 : vector<1x128xbf16> to vector<8x128xbf16>
    %34 = arith.addf %31, %33 : vector<8x128xbf16>
    %cst_23 = arith.constant 1.000980e-02 : bf16
    %35 = vector.broadcast %cst_23 : bf16 to vector<8x128xbf16>
    %36 = arith.mulf %35, %34 : vector<8x128xbf16>
    %37 = arith.maximumf %34, %36 : vector<8x128xbf16>
    %c0_24 = arith.constant 0 : index
    %c0_25 = arith.constant 0 : index
    %38 = vector.load %arg10[%c0_24, %c0_25] : memref<1x128xbf16, #tpu.memory_space<vmem>>, vector<1x128xbf16>
    %39 = arith.extf %38 : vector<1x128xbf16> to vector<1x128xf32>
    %40 = arith.extf %37 : vector<8x128xbf16> to vector<8x128xf32>
    %41 = vector.broadcast %39 : vector<1x128xf32> to vector<8x128xf32>
    %42 = arith.mulf %40, %41 : vector<8x128xf32>
    %cst_26 = arith.constant dense<0.000000e+00> : vector<8xf32>
    %43 = vector.multi_reduction <add>, %42, %cst_26 [1] : vector<8x128xf32> to vector<8xf32>
    %44 = vector.shape_cast %43 : vector<8xf32> to vector<8x1xf32>
    %c0_27 = arith.constant 0 : index
    %c0_28 = arith.constant 0 : index
    %45 = vector.load %arg11[%c0_27, %c0_28] : memref<1x1xf32, #tpu.memory_space<vmem>>, vector<1x1xf32>
    %46 = vector.broadcast %45 : vector<1x1xf32> to vector<8x1xf32>
    %47 = arith.addf %44, %46 : vector<8x1xf32>
    %c0_29 = arith.constant 0 : index
    %c0_30 = arith.constant 0 : index
    %48 = vector.load %arg12[%c0_29, %c0_30] : memref<8x1xf32, #tpu.memory_space<vmem>>, vector<8x1xf32>
    tpu.vector_store %arg12[%c0_29, %c0_30], %47 {strides = array<i32>} : memref<8x1xf32, #tpu.memory_space<vmem>>, vector<8x1xf32>,
    return
  }
  func.func @transform_0(%arg0: i32) -> (i32, i32) {
    %c0_i32 = arith.constant 0 : i32
    %c0_i32_0 = arith.constant 0 : i32
    return %arg0, %c0_i32 : i32, i32
  }
  func.func @transform_1(%arg0: i32) -> (i32, i32) {
    %c0_i32 = arith.constant 0 : i32
    %c0_i32_0 = arith.constant 0 : i32
    %c0_i32_1 = arith.constant 0 : i32
    return %c0_i32, %c0_i32_0 : i32, i32
  }
  func.func @transform_2(%arg0: i32) -> (i32, i32) {
    %c0_i32 = arith.constant 0 : i32
    %c0_i32_0 = arith.constant 0 : i32
    %c0_i32_1 = arith.constant 0 : i32
    return %c0_i32, %c0_i32_0 : i32, i32
  }
  func.func @transform_3(%arg0: i32) -> (i32, i32) {
    %c0_i32 = arith.constant 0 : i32
    %c0_i32_0 = arith.constant 0 : i32
    %c0_i32_1 = arith.constant 0 : i32
    return %c0_i32, %c0_i32_0 : i32, i32
  }
  func.func @transform_4(%arg0: i32) -> (i32, i32) {
    %c0_i32 = arith.constant 0 : i32
    %c0_i32_0 = arith.constant 0 : i32
    %c0_i32_1 = arith.constant 0 : i32
    return %c0_i32, %c0_i32_0 : i32, i32
  }
  func.func @transform_5(%arg0: i32) -> (i32, i32) {
    %c0_i32 = arith.constant 0 : i32
    %c0_i32_0 = arith.constant 0 : i32
    %c0_i32_1 = arith.constant 0 : i32
    return %c0_i32, %c0_i32_0 : i32, i32
  }
  func.func @transform_6(%arg0: i32) -> (i32, i32) {
    %c0_i32 = arith.constant 0 : i32
    %c0_i32_0 = arith.constant 0 : i32
    %c0_i32_1 = arith.constant 0 : i32
    return %c0_i32, %c0_i32_0 : i32, i32
  }
  func.func @transform_7(%arg0: i32) -> (i32, i32) {
    %c0_i32 = arith.constant 0 : i32
    %c0_i32_0 = arith.constant 0 : i32
    %c0_i32_1 = arith.constant 0 : i32
    return %c0_i32, %c0_i32_0 : i32, i32
  }
  func.func @transform_8(%arg0: i32) -> (i32, i32) {
    %c0_i32 = arith.constant 0 : i32
    %c0_i32_0 = arith.constant 0 : i32
    %c0_i32_1 = arith.constant 0 : i32
    return %c0_i32, %c0_i32_0 : i32, i32
  }
  func.func @transform_9(%arg0: i32) -> (i32, i32) {
    %c0_i32 = arith.constant 0 : i32
    %c0_i32_0 = arith.constant 0 : i32
    %c0_i32_1 = arith.constant 0 : i32
    return %c0_i32, %c0_i32_0 : i32, i32
  }
  func.func @transform_10(%arg0: i32) -> (i32, i32) {
    %c0_i32 = arith.constant 0 : i32
    %c0_i32_0 = arith.constant 0 : i32
    %c0_i32_1 = arith.constant 0 : i32
    return %c0_i32, %c0_i32_0 : i32, i32
  }
  func.func @transform_11(%arg0: i32) -> (i32, i32) {
    %c0_i32 = arith.constant 0 : i32
    %c0_i32_0 = arith.constant 0 : i32
    return %arg0, %c0_i32 : i32, i32
  }
}

</mosaic_0001>

<bundles_post_ra>
// kernel: critic_forward.1
= control target key start
LH: loop header
LB: loop body
LE: loop exit
PB: predicated region body
PF: predicated region fallthrough
CT: control target
= control target key end

     0   :  { %s5252_s0 = inlined_call_operand.vmem [shape: f32[8,32], index: 0, kind: input, shape index: {}]   ;;  %s5253_s1 = inlined_call_operand.hbm [shape: bf16[32,1024], index: 1, kind: input, shape index: {}]   ;;  %s5254_s2 = inlined_call_operand.vmem [shape: bf16[1,1024], index: 2, kind: input, shape index: {}]   ;;  %s5255_s3 = inlined_call_operand.hbm [shape: bf16[1024,512], index: 3, kind: input, shape index: {}]   ;;  %s5256_s4 = inlined_call_operand.vmem [shape: bf16[1,512], index: 4, kind: input, shape index: {}]   ;;  %s5257_s5 = inlined_call_operand.hbm [shape: bf16[512,256], index: 5, kind: input, shape index: {}]   ;;  %s5258_s6 = inlined_call_operand.vmem [shape: bf16[1,256], index: 6, kind: input, shape index: {}]   ;;  %s5259_s7 = inlined_call_operand.hbm [shape: bf16[256,128], index: 7, kind: input, shape index: {}]   ;;  %s5260_s8 = inlined_call_operand.vmem [shape: bf16[1,128], index: 8, kind: input, shape index: {}]   ;;  %s5261_s9 = inlined_call_operand.vmem [shape: bf16[1,128], index: 9, kind: input, shape index: {}]   ;;  %s5262_s10 = inlined_call_operand.<no memory space> [shape: f32[1,1], index: 10, kind: input, shape index: {}]   ;;  %s5263_s11 = inlined_call_operand.vmem [shape: f32[8,1], index: 11, kind: output, shape index: {}]  }
   0x1   :  { %v16_v0 = vstv %s5262_s10 }
   0x2   :  { %17 = vst [vmem:[#allocation2] sm:$0x1] %v16_v0 }
   0x3   :  { %18 = vsyncpa [#allocation4], 0 }
   0x4   :  { %19 = vsyncpa [#allocation6], 0  ;;  %s42_s21 = sshll.u32 %s5255_s3, 4  ;;  %s43_s21 = int_to_ptr.hbm [resolvable:$true] %s42_s21 }
   0x5   :  { %20 = vsyncpa [#allocation9], 0  ;;  %s5022_s22 = smov [#allocation5]   ;;  %s27_s26 = sshll.u32 %s5253_s1, 4  ;;  %s28_s26 = int_to_ptr.hbm [resolvable:$true] %s27_s26 }
   0x6   :  { %s44_s23 = sshll.u32 %s5022_s22, 4  ;;  %s5023_s27 = smov 256   ;;  %s45_s23 = int_to_ptr.vmem [resolvable:$true] %s44_s23 }
   0x7   :  { %s5024_s28 = smov 16   ;;  %s5025_s10 = smov [#allocation3]  }
   0x8   :  { %50 = dma.hbm_to_vmem [thread:$0]  %s43_s21, 32768, %s45_s23, [#allocation6], %s5023_s27, %s5023_s27, %s5024_s28  }
   0x9   :  { %s29_s29 = sshll.u32 %s5025_s10, 4  ;;  %s5026_s30 = smov 512   ;;  %s30_s29 = int_to_ptr.vmem [resolvable:$true] %s29_s29 }
   0xa   :  { %s5027_s12 = smov 32   ;;  %s57_s14 = sshll.u32 %s5257_s5, 4  ;;  %s58_s14 = int_to_ptr.hbm [resolvable:$true] %s57_s14 }
   0xb   :  { %35 = dma.hbm_to_vmem [thread:$0]  %s28_s26, 2048, %s30_s29, [#allocation4], %s5026_s30, %s5026_s30, %s5027_s12  }
   0xc   :  { %s5028_s15 = smov [#allocation7]   ;;  %s72_s18 = sshll.u32 %s5259_s7, 4  ;;  %s73_s18 = int_to_ptr.hbm [resolvable:$true] %s72_s18 }
   0xd   :  { %s59_s16 = sshll.u32 %s5028_s15, 4  ;;  %s5029_s19 = smov 128   ;;  %s60_s16 = int_to_ptr.vmem [resolvable:$true] %s59_s16 }
   0xe   :  { %s5030_s20 = smov 8   ;;  %s5031_s21 = smov [#allocation8]  }
   0xf   :  { %65 = dma.hbm_to_vmem [thread:$0]  %s58_s14, 8192, %s60_s16, [#allocation6], %s5029_s19, %s5029_s19, %s5030_s20  }
  0x10   :  { %s74_s22 = sshll.u32 %s5031_s21, 4  ;;  %s5032_s23 = smov 64   ;;  %s75_s22 = int_to_ptr.vmem [resolvable:$true] %s74_s22 }
  0x11   :  { %s5033_s24 = smov 4  }
  0x12   :  { %80 = dma.hbm_to_vmem [thread:$0]  %s73_s18, 2048, %s75_s22, [#allocation9], %s5032_s23, %s5032_s23, %s5033_s24  }
  0x13   :  { %5016 = dma.done.wait [#allocation4], 2048  }
  0x14   :  { %5017 = vsyncadd [#allocation4], 4294965248 }
  0x15   :  { %5018 = dma.done.wait [#allocation6], 40960  }
  0x16   :  { %5019 = vsyncadd [#allocation6], 4294926336 }
  0x17   :  { %5020 = dma.done.wait [#allocation9], 2048  }
  0x18   :  { %5021 = vsyncadd [#allocation9], 4294965248  ;;  %v3173_v1 = vld [vmem:[#allocation3 + $0x40] sm:$0xf]  ;;  %v4563_v3 = vld [vmem:[#allocation3 + $0x44] sm:$0xf] }
  0x19   :  { %v4567_v2 = vld [vmem:[#allocation3 + $0x5c] sm:$0xf0]  ;;  %v3175_v5 = vld [vmem:[#allocation3 + $0x60] sm:$0xf0]  ;;  %v104_v11 = vld [vmem:[%s5252_s0] sm:$0xff]  ;;  %vm202_vm0 = vcmask 261120  }
  0x1a   :  { %v3174_v4 = vor.u32 %v4567_v2, %v3173_v1  ;;  %v3141_v6 = vld [vmem:[#allocation3] sm:$0xf]  ;;  %v3178_v8 = vor.u32 %v4563_v3, %v3175_v5  ;;  %v4555_v9 = vld [vmem:[#allocation3 + $0x4] sm:$0xf]  ;;  %v3181_v13 = vld [vmem:[#allocation3 + $0x48] sm:$0xf]  ;;  %v5112_v25 = vpack.c.bf16 %v104_v11, %v104_v11 }
  0x1b   :  { %v4559_v7 = vld [vmem:[#allocation3 + $0x1c] sm:$0xf0]  ;;  %v3143_v10 = vld [vmem:[#allocation3 + $0x20] sm:$0xf0]  ;;  %v4568_v14 = vld [vmem:[#allocation3 + $0x64] sm:$0xf0] }
  0x1c   :  { %212 = vmatpush.bf16.msra.mxu2 %v3174_v4  ;;  %v3142_v12 = vor.u32 %v4559_v7, %v3141_v6  ;;  %v4564_v15 = vld [vmem:[#allocation3 + $0x4c] sm:$0xf]  ;;  %225 = vmatpush.bf16.msra.mxu3 %v3178_v8  ;;  %v3146_v16 = vor.u32 %v4555_v9, %v3143_v10  ;;  %v3182_v17 = vor.u32 %v4568_v14, %v3181_v13  ;;  %v3149_v19 = vld [vmem:[#allocation3 + $0x8] sm:$0xf]  ;;  %v3189_v24 = vld [vmem:[#allocation3 + $0x50] sm:$0xf] }
  0x1d   :  { %v3183_v18 = vld [vmem:[#allocation3 + $0x68] sm:$0xf0]  ;;  %v4560_v20 = vld [vmem:[#allocation3 + $0x24] sm:$0xf0]  ;;  %v4569_v26 = vld [vmem:[#allocation3 + $0x6c] sm:$0xf0] }
  0x1e   :  { %v3186_v21 = vor.u32 %v4564_v15, %v3183_v18  ;;  %v4556_v22 = vld [vmem:[#allocation3 + $0xc] sm:$0xf]  ;;  %v4565_v27 = vld [vmem:[#allocation3 + $0x54] sm:$0xf]  ;;  %v3190_v29 = vor.u32 %v4569_v26, %v3189_v24  ;;  %v3157_v31 = vld [vmem:[#allocation3 + $0x10] sm:$0xf]  ;;  %v3150_v34 = vor.u32 %v4560_v20, %v3149_v19 }
  0x1f   :  { %v3151_v23 = vld [vmem:[#allocation3 + $0x28] sm:$0xf0]  ;;  %v3191_v28 = vld [vmem:[#allocation3 + $0x70] sm:$0xf0]  ;;  %v4561_v32 = vld [vmem:[#allocation3 + $0x2c] sm:$0xf0] }
  0x20   :  { %213 = vmatpush.bf16.msra.mxu2 %v3142_v12  ;;  %v3194_v30 = vor.u32 %v4565_v27, %v3191_v28  ;;  %v4557_v33 = vld [vmem:[#allocation3 + $0x14] sm:$0xf]  ;;  %226 = vmatpush.bf16.msra.mxu3 %v3146_v16  ;;  %v3197_v36 = vld [vmem:[#allocation3 + $0x58] sm:$0xf]  ;;  %v3154_v38 = vor.u32 %v4556_v22, %v3151_v23  ;;  %v3158_v39 = vor.u32 %v4561_v32, %v3157_v31  ;;  %v4566_v40 = vld [vmem:[#allocation3 + $0x5c] sm:$0xf] }
  0x21   :  { %v3159_v35 = vld [vmem:[#allocation3 + $0x30] sm:$0xf0]  ;;  %v4570_v37 = vld [vmem:[#allocation3 + $0x74] sm:$0xf0]  ;;  %264 = vmatpush.bf16.msra.mxu0 %v3190_v29  ;;  %v3199_v41 = vld [vmem:[#allocation3 + $0x78] sm:$0xf0] }
  0x22   :  { %v3165_v42 = vld [vmem:[#allocation3 + $0x18] sm:$0xf]  ;;  %277 = vmatpush.bf16.msra.mxu1 %v3194_v30  ;;  %v3162_v43 = vor.u32 %v4557_v33, %v3159_v35  ;;  %v3198_v44 = vor.u32 %v4570_v37, %v3197_v36  ;;  %v4558_v46 = vld [vmem:[#allocation3 + $0x1c] sm:$0xf]  ;;  %v3202_v48 = vor.u32 %v4566_v40, %v3199_v41  ;;  %v3325_v49 = vld [vmem:[#allocation5 + $0xe0] sm:$0xf] }
  0x23   :  { %3203 = vmatmul.msk.bf16.vlgmr.msra.gmra.mxu2 %vm202_vm0, %v5112_v25  ;;  %v4562_v45 = vld [vmem:[#allocation3 + $0x34] sm:$0xf0]  ;;  %v3167_v47 = vld [vmem:[#allocation3 + $0x38] sm:$0xf0]  ;;  %3204 = vmatmul.msk.bf16.vlgmr.msra.gmra.mxu3 %vm202_vm0, %v5112_v25  ;;  %v4601_v50 = vld [vmem:[#allocation5 + $0xec] sm:$0xf0] }
  0x24   :  { %238 = vmatpush.bf16.msrb.mxu2 %v3182_v17  ;;  %251 = vmatpush.bf16.msrb.mxu3 %v3186_v21  ;;  %v3453_v51 = vld [vmem:[#allocation5 + $0x1e0] sm:$0xf]  ;;  %v3326_v52 = vor.u32 %v4601_v50, %v3325_v49  ;;  %v4633_v53 = vld [vmem:[#allocation5 + $0x1ec] sm:$0xf0]  ;;  %v3166_v59 = vor.u32 %v4562_v45, %v3165_v42  ;;  %v3170_v60 = vor.u32 %v4558_v46, %v3167_v47  ;;  %vm3130_vm1 = vcmask 7168  }
  0x25   :  { %v3309_v54 = vld [vmem:[#allocation5 + $0xc0] sm:$0xf]  ;;  %v4597_v55 = vld [vmem:[#allocation5 + $0xcc] sm:$0xf0]  ;;  %265 = vmatpush.bf16.msra.mxu0 %v3158_v39  ;;  %v3454_v56 = vor.u32 %v4633_v53, %v3453_v51 }
  0x26   :  { %v3437_v57 = vld [vmem:[#allocation5 + $0x1c0] sm:$0xf]  ;;  %v4629_v58 = vld [vmem:[#allocation5 + $0x1cc] sm:$0xf0]  ;;  %278 = vmatpush.bf16.msra.mxu1 %v3162_v43  ;;  %v3310_v61 = vor.u32 %v4597_v55, %v3309_v54 }
  0x27   :  { %v3438_v62 = vor.u32 %v4629_v58, %v3437_v57  ;;  %v3293_v63 = vld [vmem:[#allocation5 + $0xa0] sm:$0xf]  ;;  %v4593_v0 = vld [vmem:[#allocation5 + $0xac] sm:$0xf0] }
  0x28   :  { %239 = vmatpush.bf16.msrb.mxu2 %v3150_v34  ;;  %252 = vmatpush.bf16.msrb.mxu3 %v3154_v38  ;;  %v3421_v1 = vld [vmem:[#allocation5 + $0x1a0] sm:$0xf]  ;;  %v4625_v2 = vld [vmem:[#allocation5 + $0x1ac] sm:$0xf0]  ;;  %v3294_v3 = vor.u32 %v4593_v0, %v3293_v63 }
  0x29   :  { %1957 = vmatpush.bf16.msrb.mxu0 %v3326_v52  ;;  %3208 = vmatmul.msk.bf16.vlgmr.msra.gmra.mxu1 %vm202_vm0, %v5112_v25  ;;  %v3422_v4 = vor.u32 %v4625_v2, %v3421_v1  ;;  %v3277_v5 = vld [vmem:[#allocation5 + $0x80] sm:$0xf]  ;;  %v4589_v6 = vld [vmem:[#allocation5 + $0x8c] sm:$0xf0] }
  0x2a   :  { %3207 = vmatmul.msk.bf16.vlgmr.msra.gmra.mxu0 %vm202_vm0, %v5112_v25  ;;  %1970 = vmatpush.bf16.msrb.mxu1 %v3454_v56  ;;  %v3405_v7 = vld [vmem:[#allocation5 + $0x180] sm:$0xf]  ;;  %v4621_v8 = vld [vmem:[#allocation5 + $0x18c] sm:$0xf0]  ;;  %v3278_v13 = vor.u32 %v4589_v6, %v3277_v5 }
  0x2b   :  { %v3581_v9 = vld [vmem:[#allocation5 + $0x2e0] sm:$0xf]  ;;  %v4665_v10 = vld [vmem:[#allocation5 + $0x2ec] sm:$0xf0]  ;;  %v3406_v14 = vor.u32 %v4621_v8, %v3405_v7 }
  0x2c   :  { %290 = vmatpush.bf16.msra.mxu2 %v3198_v44  ;;  %303 = vmatpush.bf16.msra.mxu3 %v3202_v48  ;;  %v3709_v11 = vld [vmem:[#allocation5 + $0x3e0] sm:$0xf]  ;;  %v4697_v12 = vld [vmem:[#allocation5 + $0x3ec] sm:$0xf0]  ;;  %v3582_v18 = vor.u32 %v4665_v10, %v3581_v9 }
  0x2d   :  { %1958 = vmatpush.bf16.msrb.mxu0 %v3310_v61  ;;  %v3261_v15 = vld [vmem:[#allocation5 + $0x60] sm:$0xf]  ;;  %v4585_v16 = vld [vmem:[#allocation5 + $0x6c] sm:$0xf0]  ;;  %v3710_v20 = vor.u32 %v4697_v12, %v3709_v11 }
  0x2e   :  { %1971 = vmatpush.bf16.msrb.mxu1 %v3438_v62  ;;  %v3389_v17 = vld [vmem:[#allocation5 + $0x160] sm:$0xf]  ;;  %v4617_v19 = vld [vmem:[#allocation5 + $0x16c] sm:$0xf0]  ;;  %v3262_v26 = vor.u32 %v4585_v16, %v3261_v15 }
  0x2f   :  { %v3565_v21 = vld [vmem:[#allocation5 + $0x2c0] sm:$0xf]  ;;  %v4661_v22 = vld [vmem:[#allocation5 + $0x2cc] sm:$0xf0]  ;;  %v3390_v27 = vor.u32 %v4617_v19, %v3389_v17 }
  0x30   :  { %291 = vmatpush.bf16.msra.mxu2 %v3166_v59  ;;  %304 = vmatpush.bf16.msra.mxu3 %v3170_v60  ;;  %v3693_v23 = vld [vmem:[#allocation5 + $0x3c0] sm:$0xf]  ;;  %v4693_v24 = vld [vmem:[#allocation5 + $0x3cc] sm:$0xf0]  ;;  %v3566_v31 = vor.u32 %v4661_v22, %v3565_v21 }
  0x31   :  { %1959 = vmatpush.bf16.msrb.mxu0 %v3294_v3  ;;  %v3245_v28 = vld [vmem:[#allocation5 + $0x40] sm:$0xf]  ;;  %v4581_v29 = vld [vmem:[#allocation5 + $0x4c] sm:$0xf0]  ;;  %v3694_v33 = vor.u32 %v4693_v24, %v3693_v23 }
  0x32   :  { %1972 = vmatpush.bf16.msrb.mxu1 %v3422_v4  ;;  %v3373_v30 = vld [vmem:[#allocation5 + $0x140] sm:$0xf]  ;;  %v4613_v32 = vld [vmem:[#allocation5 + $0x14c] sm:$0xf0]  ;;  %v3246_v38 = vor.u32 %v4581_v29, %v3245_v28 }
  0x33   :  { %3205 = vmatmul.msk.bf16.vlgmr.msrb.gmra.mxu2 %vm202_vm0, %v5112_v25  ;;  %3206 = vmatmul.msk.bf16.vlgmr.msrb.gmra.mxu3 %vm202_vm0, %v5112_v25  ;;  %v3549_v34 = vld [vmem:[#allocation5 + $0x2a0] sm:$0xf]  ;;  %v4657_v35 = vld [vmem:[#allocation5 + $0x2ac] sm:$0xf0]  ;;  %v3374_v39 = vor.u32 %v4613_v32, %v3373_v30  ;;  %v314_v32 = vld [vmem:[%s5254_s2] sm:$0xff] }
  0x34   :  { %1983 = vmatpush.bf16.msrb.mxu2 %v3582_v18  ;;  %1996 = vmatpush.bf16.msrb.mxu3 %v3710_v20  ;;  %v3677_v36 = vld [vmem:[#allocation5 + $0x3a0] sm:$0xf]  ;;  %v4689_v37 = vld [vmem:[#allocation5 + $0x3ac] sm:$0xf0]  ;;  %v3550_v43 = vor.u32 %v4657_v35, %v3549_v34  ;;  %316 = vst [vmem:[#allocation1] ss:$9 sm:$0xff] %v314_v32 }
  0x35   :  { %1960 = vmatpush.bf16.msrb.mxu0 %v3278_v13  ;;  %v3229_v40 = vld [vmem:[#allocation5 + $0x20] sm:$0xf]  ;;  %v4577_v41 = vld [vmem:[#allocation5 + $0x2c] sm:$0xf0]  ;;  %v3678_v45 = vor.u32 %v4689_v37, %v3677_v36 }
  0x36   :  { %1973 = vmatpush.bf16.msrb.mxu1 %v3406_v14  ;;  %v3357_v42 = vld [vmem:[#allocation5 + $0x120] sm:$0xf]  ;;  %v4609_v44 = vld [vmem:[#allocation5 + $0x12c] sm:$0xf0]  ;;  %v3230_v50 = vor.u32 %v4577_v41, %v3229_v40 }
  0x37   :  { %v3533_v46 = vld [vmem:[#allocation5 + $0x280] sm:$0xf]  ;;  %v4653_v47 = vld [vmem:[#allocation5 + $0x28c] sm:$0xf0]  ;;  %v3358_v52 = vor.u32 %v4609_v44, %v3357_v42 }
  0x38   :  { %1984 = vmatpush.bf16.msrb.mxu2 %v3566_v31  ;;  %1997 = vmatpush.bf16.msrb.mxu3 %v3694_v33  ;;  %v3661_v48 = vld [vmem:[#allocation5 + $0x380] sm:$0xf]  ;;  %v4685_v49 = vld [vmem:[#allocation5 + $0x38c] sm:$0xf0]  ;;  %v3534_v56 = vor.u32 %v4653_v47, %v3533_v46 }
  0x39   :  { %1961 = vmatpush.bf16.msrb.mxu0 %v3262_v26  ;;  %v3213_v51 = vld [vmem:[#allocation5] sm:$0xf]  ;;  %v4573_v53 = vld [vmem:[#allocation5 + $0xc] sm:$0xf0]  ;;  %v3662_v57 = vor.u32 %v4685_v49, %v3661_v48 }
  0x3a   :  { %1974 = vmatpush.bf16.msrb.mxu1 %v3390_v27  ;;  %v3341_v54 = vld [vmem:[#allocation5 + $0x100] sm:$0xf]  ;;  %v4605_v55 = vld [vmem:[#allocation5 + $0x10c] sm:$0xf0]  ;;  %v3214_v0 = vor.u32 %v4573_v53, %v3213_v51 }
  0x3b   :  { %v3837_v58 = vld [vmem:[#allocation5 + $0x4e0] sm:$0xf]  ;;  %v4729_v59 = vld [vmem:[#allocation5 + $0x4ec] sm:$0xf0]  ;;  %v3342_v3 = vor.u32 %v4605_v55, %v3341_v54 }
  0x3c   :  { %1985 = vmatpush.bf16.msrb.mxu2 %v3550_v43  ;;  %1998 = vmatpush.bf16.msrb.mxu3 %v3678_v45  ;;  %v3965_v60 = vld [vmem:[#allocation5 + $0x5e0] sm:$0xf]  ;;  %v4761_v61 = vld [vmem:[#allocation5 + $0x5ec] sm:$0xf0]  ;;  %v3838_v4 = vor.u32 %v4729_v59, %v3837_v58 }
  0x3d   :  { %1962 = vmatpush.bf16.msrb.mxu0 %v3246_v38  ;;  %v3517_v62 = vld [vmem:[#allocation5 + $0x260] sm:$0xf]  ;;  %v4649_v63 = vld [vmem:[#allocation5 + $0x26c] sm:$0xf0]  ;;  %v3966_v5 = vor.u32 %v4761_v61, %v3965_v60 }
  0x3e   :  { %1975 = vmatpush.bf16.msrb.mxu1 %v3374_v39  ;;  %v3645_v1 = vld [vmem:[#allocation5 + $0x360] sm:$0xf]  ;;  %v4681_v2 = vld [vmem:[#allocation5 + $0x36c] sm:$0xf0]  ;;  %v3518_v6 = vor.u32 %v4649_v63, %v3517_v62 }
  0x3f   :  { %v3821_v7 = vld [vmem:[#allocation5 + $0x4c0] sm:$0xf]  ;;  %v4725_v8 = vld [vmem:[#allocation5 + $0x4cc] sm:$0xf0]  ;;  %v3646_v10 = vor.u32 %v4681_v2, %v3645_v1 }
  0x40   :  { %1986 = vmatpush.bf16.msrb.mxu2 %v3534_v56  ;;  %1999 = vmatpush.bf16.msrb.mxu3 %v3662_v57  ;;  %v3949_v9 = vld [vmem:[#allocation5 + $0x5c0] sm:$0xf]  ;;  %v4757_v11 = vld [vmem:[#allocation5 + $0x5cc] sm:$0xf0]  ;;  %v3822_v16 = vor.u32 %v4725_v8, %v3821_v7 }
  0x41   :  { %1963 = vmatpush.bf16.msrb.mxu0 %v3230_v50  ;;  %v3501_v12 = vld [vmem:[#allocation5 + $0x240] sm:$0xf]  ;;  %v4645_v13 = vld [vmem:[#allocation5 + $0x24c] sm:$0xf0]  ;;  %v3950_v17 = vor.u32 %v4757_v11, %v3949_v9 }
  0x42   :  { %1976 = vmatpush.bf16.msrb.mxu1 %v3358_v52  ;;  %v3629_v14 = vld [vmem:[#allocation5 + $0x340] sm:$0xf]  ;;  %v4677_v15 = vld [vmem:[#allocation5 + $0x34c] sm:$0xf0]  ;;  %v3502_v18 = vor.u32 %v4645_v13, %v3501_v12 }
  0x43   :  { %3209 = vmatmul.msk.bf16.vlgmr.msra.gmra.mxu2 %vm202_vm0, %v5112_v25  ;;  %3210 = vmatmul.msk.bf16.vlgmr.msra.gmra.mxu3 %vm202_vm0, %v5112_v25  ;;  %v3805_v19 = vld [vmem:[#allocation5 + $0x4a0] sm:$0xf]  ;;  %v4721_v20 = vld [vmem:[#allocation5 + $0x4ac] sm:$0xf0]  ;;  %v3630_v22 = vor.u32 %v4677_v15, %v3629_v14 }
  0x44   :  { %1987 = vmatpush.bf16.msrb.mxu2 %v3518_v6  ;;  %v3933_v21 = vld [vmem:[#allocation5 + $0x5a0] sm:$0xf]  ;;  %2000 = vmatpush.bf16.msrb.mxu3 %v3646_v10  ;;  %v4753_v23 = vld [vmem:[#allocation5 + $0x5ac] sm:$0xf0]  ;;  %v3806_v28 = vor.u32 %v4721_v20, %v3805_v19 }
  0x45   :  { %1964 = vmatpush.bf16.msrb.mxu0 %v3214_v0  ;;  %v3485_v24 = vld [vmem:[#allocation5 + $0x220] sm:$0xf]  ;;  %v4641_v26 = vld [vmem:[#allocation5 + $0x22c] sm:$0xf0]  ;;  %v3934_v29 = vor.u32 %v4753_v23, %v3933_v21 }
  0x46   :  { %1977 = vmatpush.bf16.msrb.mxu1 %v3342_v3  ;;  %v3613_v27 = vld [vmem:[#allocation5 + $0x320] sm:$0xf]  ;;  %v4673_v25 = vld [vmem:[#allocation5 + $0x32c] sm:$0xf0]  ;;  %v3486_v30 = vor.u32 %v4641_v26, %v3485_v24 }
  0x47   :  { %v3614_v31 = vor.u32 %v4673_v25, %v3613_v27  ;;  %v3789_v33 = vld [vmem:[#allocation5 + $0x480] sm:$0xf]  ;;  %v4717_v34 = vld [vmem:[#allocation5 + $0x48c] sm:$0xf0] }
  0x48   :  { %1988 = vmatpush.bf16.msrb.mxu2 %v3502_v18  ;;  %2001 = vmatpush.bf16.msrb.mxu3 %v3630_v22  ;;  %v3917_v35 = vld [vmem:[#allocation5 + $0x580] sm:$0xf]  ;;  %v3790_v36 = vor.u32 %v4717_v34, %v3789_v33  ;;  %v4749_v37 = vld [vmem:[#allocation5 + $0x58c] sm:$0xf0]  ;;  %v317_v34 = vld [vmem:[#allocation1] sm:$0xff] }
  0x49   :  { %2009 = vmatpush.bf16.msra.mxu0 %v3838_v4  ;;  %v3918_v38 = vor.u32 %v4749_v37, %v3917_v35  ;;  %v3469_v39 = vld [vmem:[#allocation5 + $0x200] sm:$0xf]  ;;  %v4637_v40 = vld [vmem:[#allocation5 + $0x20c] sm:$0xf0] }
  0x4a   :  { %2022 = vmatpush.bf16.msra.mxu1 %v3966_v5  ;;  %v3597_v41 = vld [vmem:[#allocation5 + $0x300] sm:$0xf]  ;;  %v3470_v42 = vor.u32 %v4637_v40, %v3469_v39  ;;  %v4669_v43 = vld [vmem:[#allocation5 + $0x30c] sm:$0xf0] }
  0x4b   :  { %v3773_v44 = vld [vmem:[#allocation5 + $0x460] sm:$0xf]  ;;  %v3598_v45 = vor.u32 %v4669_v43, %v3597_v41  ;;  %v4713_v46 = vld [vmem:[#allocation5 + $0x46c] sm:$0xf0]  ;;  %v325_v43 = vpack.i.b16 %v317_v34, %v317_v34  ;;  %v3327_v34 = vld [vmem:[#allocation5 + $0xf0] sm:$0xf0] }
  0x4c   :  { %1989 = vmatpush.bf16.msrb.mxu2 %v3486_v30  ;;  %2002 = vmatpush.bf16.msrb.mxu3 %v3614_v31  ;;  %v3901_v47 = vld [vmem:[#allocation5 + $0x560] sm:$0xf]  ;;  %v4745_v48 = vld [vmem:[#allocation5 + $0x56c] sm:$0xf0]  ;;  %v3774_v49 = vor.u32 %v4713_v46, %v3773_v44 }
  0x4d   :  { %2010 = vmatpush.bf16.msra.mxu0 %v3822_v16  ;;  %v3902_v50 = vor.u32 %v4745_v48, %v3901_v47  ;;  %v4093_v51 = vld [vmem:[#allocation5 + $0x6e0] sm:$0xf]  ;;  %v4793_v52 = vld [vmem:[#allocation5 + $0x6ec] sm:$0xf0] }
  0x4e   :  { %2023 = vmatpush.bf16.msra.mxu1 %v3950_v17  ;;  %v4221_v53 = vld [vmem:[#allocation5 + $0x7e0] sm:$0xf]  ;;  %v4094_v54 = vor.u32 %v4793_v52, %v4093_v51  ;;  %v4825_v55 = vld [vmem:[#allocation5 + $0x7ec] sm:$0xf0] }
  0x4f   :  { %v4222_v56 = vor.u32 %v4825_v55, %v4221_v53  ;;  %v3757_v57 = vld [vmem:[#allocation5 + $0x440] sm:$0xf]  ;;  %v4709_v58 = vld [vmem:[#allocation5 + $0x44c] sm:$0xf0]  ;;  %v327_v53 = vperm.slane %v325_v43, 0 }
  0x50   :  { %1990 = vmatpush.bf16.msrb.mxu2 %v3470_v42  ;;  %2003 = vmatpush.bf16.msrb.mxu3 %v3598_v45  ;;  %v3885_v59 = vld [vmem:[#allocation5 + $0x540] sm:$0xf]  ;;  %v3758_v60 = vor.u32 %v4709_v58, %v3757_v57  ;;  %v4741_v61 = vld [vmem:[#allocation5 + $0x54c] sm:$0xf0] }
  0x51   :  { %2011 = vmatpush.bf16.msra.mxu0 %v3806_v28  ;;  %v4077_v62 = vld [vmem:[#allocation5 + $0x6c0] sm:$0xf]  ;;  %v4789_v63 = vld [vmem:[#allocation5 + $0x6cc] sm:$0xf0]  ;;  %v3886_v0 = vor.u32 %v4741_v61, %v3885_v59 }
  0x52   :  { %2024 = vmatpush.bf16.msra.mxu1 %v3934_v29  ;;  %v4078_v1 = vor.u32 %v4789_v63, %v4077_v62  ;;  %v4205_v2 = vld [vmem:[#allocation5 + $0x7c0] sm:$0xf]  ;;  %v4821_v3 = vld [vmem:[#allocation5 + $0x7cc] sm:$0xf0] }
  0x53   :  { %v4206_v4 = vor.u32 %v4821_v3, %v4205_v2  ;;  %v3741_v5 = vld [vmem:[#allocation5 + $0x420] sm:$0xf]  ;;  %v4705_v6 = vld [vmem:[#allocation5 + $0x42c] sm:$0xf0] }
  0x54   :  { %2035 = vmatpush.bf16.msra.mxu2 %v4094_v54  ;;  %2048 = vmatpush.bf16.msra.mxu3 %v4222_v56  ;;  %v3869_v7 = vld [vmem:[#allocation5 + $0x520] sm:$0xf]  ;;  %v3742_v8 = vor.u32 %v4705_v6, %v3741_v5  ;;  %v4737_v9 = vld [vmem:[#allocation5 + $0x52c] sm:$0xf0] }
  0x55   :  { %2012 = vmatpush.bf16.msra.mxu0 %v3790_v36  ;;  %v4061_v10 = vld [vmem:[#allocation5 + $0x6a0] sm:$0xf]  ;;  %v4785_v11 = vld [vmem:[#allocation5 + $0x6ac] sm:$0xf0]  ;;  %v3870_v12 = vor.u32 %v4737_v9, %v3869_v7 }
  0x56   :  { %2025 = vmatpush.bf16.msra.mxu1 %v3918_v38  ;;  %v4062_v13 = vor.u32 %v4785_v11, %v4061_v10  ;;  %v4189_v14 = vld [vmem:[#allocation5 + $0x7a0] sm:$0xf]  ;;  %v4817_v15 = vld [vmem:[#allocation5 + $0x7ac] sm:$0xf0] }
  0x57   :  { %v4190_v16 = vor.u32 %v4817_v15, %v4189_v14  ;;  %v3725_v17 = vld [vmem:[#allocation5 + $0x400] sm:$0xf]  ;;  %v4701_v18 = vld [vmem:[#allocation5 + $0x40c] sm:$0xf0] }
  0x58   :  { %2036 = vmatpush.bf16.msra.mxu2 %v4078_v1  ;;  %2049 = vmatpush.bf16.msra.mxu3 %v4206_v4  ;;  %v3853_v19 = vld [vmem:[#allocation5 + $0x500] sm:$0xf]  ;;  %v3726_v20 = vor.u32 %v4701_v18, %v3725_v17  ;;  %v4733_v21 = vld [vmem:[#allocation5 + $0x50c] sm:$0xf0]  ;;  %v357_v4 = vunpack.c.l.bf16 %v327_v53 }
  0x59   :  { %2013 = vmatpush.bf16.msra.mxu0 %v3774_v49  ;;  %v4045_v22 = vld [vmem:[#allocation5 + $0x680] sm:$0xf]  ;;  %v3854_v23 = vor.u32 %v4733_v21, %v3853_v19  ;;  %v4781_v24 = vld [vmem:[#allocation5 + $0x68c] sm:$0xf0]  ;;  %v322_v49 = vld [vmem:[#allocation1 + $0x2d] sm:$0xff] }
  0x5a   :  { %2026 = vmatpush.bf16.msra.mxu1 %v3902_v50  ;;  %v4173_v26 = vld [vmem:[#allocation5 + $0x780] sm:$0xf]  ;;  %v4813_v27 = vld [vmem:[#allocation5 + $0x78c] sm:$0xf0]  ;;  %v4046_v25 = vor.u32 %v4781_v24, %v4045_v22  ;;  %v340_v56 = vpack.i.b16 %v322_v49, %v322_v49 }
  0x5b   :  { %v4174_v28 = vor.u32 %v4813_v27, %v4173_v26  ;;  %v4029_v29 = vld [vmem:[#allocation5 + $0x660] sm:$0xf]  ;;  %v4777_v30 = vld [vmem:[#allocation5 + $0x66c] sm:$0xf0] }
  0x5c   :  { %2037 = vmatpush.bf16.msra.mxu2 %v4062_v13  ;;  %2050 = vmatpush.bf16.msra.mxu3 %v4190_v16  ;;  %v4030_v31 = vor.u32 %v4777_v30, %v4029_v29  ;;  %v4157_v32 = vld [vmem:[#allocation5 + $0x760] sm:$0xf]  ;;  %v4809_v33 = vld [vmem:[#allocation5 + $0x76c] sm:$0xf0]  ;;  %v5135_v29 = vld [vmem:[#allocation1 + $0x3f] sm:$0xff] }
  0x5d   :  { %2014 = vmatpush.bf16.msra.mxu0 %v3758_v60  ;;  %v318_v35 = vld [vmem:[#allocation1 + $0x9] sm:$0xff]  ;;  %v4158_v36 = vor.u32 %v4809_v33, %v4157_v32  ;;  %v4773_v38 = vld [vmem:[#allocation5 + $0x64c] sm:$0xf0]  ;;  %v2375_v30 = vld [vmem:[%s5256_s4] sm:$0xf] }
  0x5e   :  { %2027 = vmatpush.bf16.msra.mxu1 %v3886_v0  ;;  %v4013_v37 = vld [vmem:[#allocation5 + $0x640] sm:$0xf]  ;;  %v4805_v41 = vld [vmem:[#allocation5 + $0x74c] sm:$0xf0]  ;;  %v328_v44 = vpack.i.b16 %v318_v35, %v318_v35  ;;  %v4599_v33 = vld [vmem:[#allocation5 + $0xe4] sm:$0xf] }
  0x5f   :  { %v4141_v39 = vld [vmem:[#allocation5 + $0x740] sm:$0xf]  ;;  %v4014_v40 = vor.u32 %v4773_v38, %v4013_v37  ;;  %v4769_v46 = vld [vmem:[#allocation5 + $0x62c] sm:$0xf0]  ;;  %v4631_v37 = vld [vmem:[#allocation5 + $0x1e4] sm:$0xf] }
  0x60   :  { %2038 = vmatpush.bf16.msra.mxu2 %v4046_v25  ;;  %2051 = vmatpush.bf16.msra.mxu3 %v4174_v28  ;;  %v4142_v42 = vor.u32 %v4805_v41, %v4141_v39  ;;  %v3997_v45 = vld [vmem:[#allocation5 + $0x620] sm:$0xf]  ;;  %v4801_v51 = vld [vmem:[#allocation5 + $0x72c] sm:$0xf0]  ;;  %v330_v54 = vperm.slane %v328_v44, 0  ;;  %v3330_v44 = vor.u32 %v4599_v33, %v3327_v34 }
  0x61   :  { %2015 = vmatpush.bf16.msra.mxu0 %v3742_v8  ;;  %v4125_v47 = vld [vmem:[#allocation5 + $0x720] sm:$0xf]  ;;  %v3998_v50 = vor.u32 %v4769_v46, %v3997_v45  ;;  %v4765_v58 = vld [vmem:[#allocation5 + $0x60c] sm:$0xf0]  ;;  %v342_v8 = vperm.slane %v340_v56, 0 }
  0x62   :  { %2028 = vmatpush.bf16.msra.mxu1 %v3870_v12  ;;  %v321_v48 = vld [vmem:[#allocation1 + $0x24] sm:$0xff]  ;;  %v4126_v52 = vor.u32 %v4801_v51, %v4125_v47  ;;  %v4797_v63 = vld [vmem:[#allocation5 + $0x70c] sm:$0xf0]  ;;  %v358_v5 = vunpack.c.l.bf16 %v330_v54  ;;  %v3455_v38 = vld [vmem:[#allocation5 + $0x1f0] sm:$0xf0] }
  0x63   :  { %v337_v55 = vpack.i.b16 %v321_v48, %v321_v48  ;;  %v3981_v57 = vld [vmem:[#allocation5 + $0x600] sm:$0xf]  ;;  %v319_v13 = vld [vmem:[#allocation1 + $0x12] sm:$0xff]  ;;  %v320_v14 = vld [vmem:[#allocation1 + $0x1b] sm:$0xff]  ;;  %v362_v18 = vunpack.c.l.bf16 %v342_v8  ;;  %v3458_v45 = vor.u32 %v4631_v37, %v3455_v38 }
  0x64   :  { %2039 = vmatpush.bf16.msra.mxu2 %v4030_v31  ;;  %2052 = vmatpush.bf16.msra.mxu3 %v4158_v36  ;;  %v4109_v59 = vld [vmem:[#allocation5 + $0x700] sm:$0xf]  ;;  %v3982_v62 = vor.u32 %v4765_v58, %v3981_v57  ;;  %v331_v27 = vpack.i.b16 %v319_v13, %v319_v13  ;;  %v334_v25 = vpack.i.b16 %v320_v14, %v320_v14  ;;  %v5133_v28 = vld [vmem:[#allocation1 + $0x36] sm:$0xff]  ;;  %v4595_v46 = vld [vmem:[#allocation5 + $0xc4] sm:$0xf] }
  0x65   :  { %2016 = vmatpush.bf16.msra.mxu0 %v3726_v20  ;;  %v4110_v2 = vor.u32 %v4797_v63, %v4109_v59  ;;  %v339_v7 = vperm.slane %v337_v55, 0  ;;  %2377 = vst [vmem:[#allocation1] ss:$9 sm:$0xff] %v2375_v30  ;;  %v4627_v51 = vld [vmem:[#allocation5 + $0x1c4] sm:$0xf] }
  0x66   :  { %2029 = vmatpush.bf16.msra.mxu1 %v3854_v23  ;;  %v333_v39 = vperm.slane %v331_v27, 0  ;;  %v4619_v13 = vld [vmem:[#allocation5 + $0x184] sm:$0xf]  ;;  %v3407_v14 = vld [vmem:[#allocation5 + $0x190] sm:$0xf0] }
  0x67   :  { %v361_v17 = vunpack.c.l.bf16 %v339_v7  ;;  %v4615_v30 = vld [vmem:[#allocation5 + $0x164] sm:$0xf]  ;;  %v3583_v33 = vld [vmem:[#allocation5 + $0x2f0] sm:$0xf0] }
  0x68   :  { %2040 = vmatpush.bf16.msra.mxu2 %v4014_v40  ;;  %2053 = vmatpush.bf16.msra.mxu3 %v4142_v42  ;;  %v336_v40 = vperm.slane %v334_v25, 0  ;;  %v359_v55 = vunpack.c.l.bf16 %v333_v39  ;;  %v3263_v25 = vld [vmem:[#allocation5 + $0x70] sm:$0xf0]  ;;  %v4695_v37 = vld [vmem:[#allocation5 + $0x3e4] sm:$0xf] }
  0x69   :  { %v3711_v38 = vld [vmem:[#allocation5 + $0x3f0] sm:$0xf0] }
  0x6a   :  { %v360_v56 = vunpack.c.l.bf16 %v336_v40 }
  0x6c   :  { %2041 = vmatpush.bf16.msra.mxu2 %v3998_v50  ;;  %2054 = vmatpush.bf16.msra.mxu3 %v4126_v52  ;;  %v3311_v50 = vld [vmem:[#allocation5 + $0xd0] sm:$0xf0] }
  0x6d   :  { %v3439_v52 = vld [vmem:[#allocation5 + $0x1d0] sm:$0xf0]  ;;  %v3314_v59 = vor.u32 %v4595_v46, %v3311_v50 }
  0x6e   :  { %v3247_v46 = vld [vmem:[#allocation5 + $0x50] sm:$0xf0] }
  0x70   :  { %2042 = vmatpush.bf16.msra.mxu2 %v3982_v62  ;;  %2055 = vmatpush.bf16.msra.mxu3 %v4110_v2  ;;  %v3423_v2 = vld [vmem:[#allocation5 + $0x1b0] sm:$0xf0] }
  0xa6   :  { %v215_v60 = vpop.f32.mrf.mxu2  ;;  %v228_v0 = vpop.f32.mrf.mxu3 }
  0xa7   :  { %v267_v61 = vpop.f32.mrf.mxu0  ;;  %v280_v1 = vpop.f32.mrf.mxu1  ;;  %v310_v3 = vpack.c.bf16 %v228_v0, %v215_v60  ;;  %v3442_v60 = vor.u32 %v4627_v51, %v3439_v52  ;;  %v3295_v0 = vld [vmem:[#allocation5 + $0xb0] sm:$0xf0]  ;;  %v3714_v51 = vor.u32 %v4695_v37, %v3711_v38  ;;  %v4611_v52 = vld [vmem:[#allocation5 + $0x144] sm:$0xf] }
  0xa8   :  { %v312_v6 = vpack.c.bf16 %v280_v1, %v267_v61  ;;  %v4591_v61 = vld [vmem:[#allocation5 + $0xa4] sm:$0xf] }
  0xa9   :  { %v349_v9 = vunpack.c.l.bf16 %v310_v3  ;;  %v350_v10 = vunpack.c.h.bf16 %v310_v3  ;;  %v4623_v1 = vld [vmem:[#allocation5 + $0x1a4] sm:$0xf]  ;;  %v3298_v7 = vor.u32 %v4591_v61, %v3295_v0 }
  0xaa   :  { %v353_v15 = vunpack.c.l.bf16 %v312_v6  ;;  %v354_v16 = vunpack.c.h.bf16 %v312_v6  ;;  %v3279_v6 = vld [vmem:[#allocation5 + $0x90] sm:$0xf0]  ;;  %v3426_v8 = vor.u32 %v4623_v1, %v3423_v2  ;;  %v4575_v1 = vld [vmem:[#allocation5 + $0x24] sm:$0xf] }
  0xab   :  { %v365_v11 = vadd.f32 %v357_v4, %v349_v9  ;;  %v366_v12 = vadd.f32 %v358_v5, %v350_v10  ;;  %v4587_v5 = vld [vmem:[#allocation5 + $0x84] sm:$0xf]  ;;  %v3231_v2 = vld [vmem:[#allocation5 + $0x30] sm:$0xf0] }
  0xac   :  { %v369_v31 = vadd.f32 %v361_v17, %v353_v15  ;;  %v370_v32 = vadd.f32 %v362_v18, %v354_v16  ;;  %v3282_v16 = vor.u32 %v4587_v5, %v3279_v6  ;;  %v4607_v5 = vld [vmem:[#allocation5 + $0x124] sm:$0xf]  ;;  %v3359_v6 = vld [vmem:[#allocation5 + $0x130] sm:$0xf0] }
  0xad   :  { %v373_v19 = vpack.c.bf16 %v366_v12, %v365_v11 }
  0xae   :  { %v217_v20 = vpop.f32.mrf.mxu2  ;;  %v230_v22 = vpop.f32.mrf.mxu3  ;;  %v375_v43 = vpack.c.bf16 %v370_v32, %v369_v31  ;;  %v3391_v31 = vld [vmem:[#allocation5 + $0x170] sm:$0xf0]  ;;  %v4663_v32 = vld [vmem:[#allocation5 + $0x2e4] sm:$0xf] }
  0xaf   :  { %v269_v21 = vpop.f32.mrf.mxu0  ;;  %v282_v23 = vpop.f32.mrf.mxu1  ;;  %v377_v24 = vunpack.c.l.bf16 %v373_v19  ;;  %v378_v26 = vunpack.c.h.bf16 %v373_v19  ;;  %v343_v19 = vpack.i.b16 %v5133_v28, %v5133_v28  ;;  %v346_v20 = vpack.i.b16 %v5135_v29, %v5135_v29 }
  0xb0   :  { %v381_v57 = vunpack.c.l.bf16 %v375_v43  ;;  %v382_v58 = vunpack.c.h.bf16 %v375_v43  ;;  %v3410_v21 = vor.u32 %v4619_v13, %v3407_v14  ;;  %v3586_v50 = vor.u32 %v4663_v32, %v3583_v33  ;;  %v4727_v32 = vld [vmem:[#allocation5 + $0x4e4] sm:$0xf]  ;;  %v3839_v33 = vld [vmem:[#allocation5 + $0x4f0] sm:$0xf0] }
  0xb1   :  { %v385_v35 = vmul.f32 0.010009766, %v377_v24  ;;  %v386_v36 = vmul.f32 0.010009766, %v378_v26  ;;  %v345_v34 = vperm.slane %v343_v19, 0  ;;  %v3234_v14 = vor.u32 %v4575_v1, %v3231_v2  ;;  %v4603_v19 = vld [vmem:[#allocation5 + $0x104] sm:$0xf] }
  0xb2   :  { %v389_v9 = vmul.f32 0.010009766, %v381_v57  ;;  %v390_v10 = vmul.f32 0.010009766, %v382_v58  ;;  %v4675_v2 = vld [vmem:[#allocation5 + $0x344] sm:$0xf] }
  0xb3   :  { %v405_v41 = vmax.f32 %v377_v24, %v385_v35  ;;  %v406_v42 = vmax.f32 %v378_v26, %v386_v36  ;;  %v4583_v24 = vld [vmem:[#allocation5 + $0x64] sm:$0xf]  ;;  %v348_v35 = vperm.slane %v346_v20, 0 }
  0xb4   :  { %v409_v22 = vmax.f32 %v381_v57, %v389_v9  ;;  %v410_v23 = vmax.f32 %v382_v58, %v390_v10  ;;  %v3266_v43 = vor.u32 %v4583_v24, %v3263_v25  ;;  %v3567_v58 = vld [vmem:[#allocation5 + $0x2d0] sm:$0xf0]  ;;  %v4651_v24 = vld [vmem:[#allocation5 + $0x284] sm:$0xf] }
  0xb5   :  { %v5140_v48 = vpack.c.bf16 %v405_v41, %v405_v41  ;;  %v5142_v49 = vpack.c.bf16 %v406_v42, %v406_v42  ;;  %v364_v57 = vunpack.c.l.bf16 %v348_v35  ;;  %v3551_v10 = vld [vmem:[#allocation5 + $0x2b0] sm:$0xf0] }
  0xb6   :  { %v241_v47 = vpop.f32.mrf.mxu2  ;;  %v254_v53 = vpop.f32.mrf.mxu3  ;;  %v5150_v29 = vpack.c.bf16 %v409_v22, %v409_v22  ;;  %v5152_v39 = vpack.c.bf16 %v410_v23, %v410_v23  ;;  %v3343_v23 = vld [vmem:[#allocation5 + $0x110] sm:$0xf0] }
  0xb7   :  { %v311_v54 = vpack.c.bf16 %v254_v53, %v241_v47  ;;  %1965 = vmatmul.bf16.vlgmr.msrb.gmra.mxu0 %v5140_v48  ;;  %1978 = vmatmul.bf16.vlgmr.msrb.gmra.mxu1 %v5142_v49  ;;  %v3375_v53 = vld [vmem:[#allocation5 + $0x150] sm:$0xf0] }
  0xb8   :  { %2061 = vmatpush.bf16.msrb.mxu0 %v3330_v44  ;;  %2074 = vmatpush.bf16.msrb.mxu1 %v3458_v45  ;;  %v3394_v44 = vor.u32 %v4615_v30, %v3391_v31  ;;  %v4579_v45 = vld [vmem:[#allocation5 + $0x44] sm:$0xf]  ;;  %v3378_v0 = vor.u32 %v4611_v52, %v3375_v53  ;;  %v3663_v31 = vld [vmem:[#allocation5 + $0x390] sm:$0xf0] }
  0xb9   :  { %v351_v62 = vunpack.c.l.bf16 %v311_v54  ;;  %v352_v63 = vunpack.c.h.bf16 %v311_v54  ;;  %v4659_v54 = vld [vmem:[#allocation5 + $0x2c4] sm:$0xf]  ;;  %v3967_v35 = vld [vmem:[#allocation5 + $0x5f0] sm:$0xf0] }
  0xba   :  { %v4683_v30 = vld [vmem:[#allocation5 + $0x384] sm:$0xf]  ;;  %v3647_v53 = vld [vmem:[#allocation5 + $0x370] sm:$0xf0] }
  0xbb   :  { %v367_v3 = vadd.f32 %v359_v55, %v351_v62  ;;  %v368_v4 = vadd.f32 %v360_v56, %v352_v63  ;;  %v363_v56 = vunpack.c.l.bf16 %v345_v34  ;;  %v3250_v63 = vor.u32 %v4579_v45, %v3247_v46  ;;  %v4759_v34 = vld [vmem:[#allocation5 + $0x5e4] sm:$0xf]  ;;  %v3519_v45 = vld [vmem:[#allocation5 + $0x270] sm:$0xf0] }
  0xbc   :  { %2062 = vmatpush.bf16.msrb.mxu0 %v3314_v59  ;;  %2075 = vmatpush.bf16.msrb.mxu1 %v3442_v60  ;;  %v4691_v59 = vld [vmem:[#allocation5 + $0x3c4] sm:$0xf]  ;;  %v3695_v60 = vld [vmem:[#allocation5 + $0x3d0] sm:$0xf0]  ;;  %v3842_v46 = vor.u32 %v4727_v32, %v3839_v33 }
  0xbd   :  { %v374_v11 = vpack.c.bf16 %v368_v4, %v367_v3  ;;  %v3570_v3 = vor.u32 %v4659_v54, %v3567_v58  ;;  %v3698_v4 = vor.u32 %v4691_v59, %v3695_v60  ;;  %v4679_v52 = vld [vmem:[#allocation5 + $0x364] sm:$0xf]  ;;  %v3903_v33 = vld [vmem:[#allocation5 + $0x570] sm:$0xf0] }
  0xbe   :  { %v243_v12 = vpop.f32.mrf.mxu2  ;;  %v256_v15 = vpop.f32.mrf.mxu3  ;;  %v4723_v54 = vld [vmem:[#allocation5 + $0x4c4] sm:$0xf] }
  0xbf   :  { %v379_v17 = vunpack.c.l.bf16 %v374_v11  ;;  %v380_v18 = vunpack.c.h.bf16 %v374_v11  ;;  %v4687_v11 = vld [vmem:[#allocation5 + $0x3a4] sm:$0xf]  ;;  %v3679_v12 = vld [vmem:[#allocation5 + $0x3b0] sm:$0xf0]  ;;  %v3362_v15 = vor.u32 %v4607_v5, %v3359_v6 }
  0xc0   :  { %2063 = vmatpush.bf16.msrb.mxu0 %v3298_v7  ;;  %2076 = vmatpush.bf16.msrb.mxu1 %v3426_v8  ;;  %v4655_v7 = vld [vmem:[#allocation5 + $0x2a4] sm:$0xf]  ;;  %v3807_v5 = vld [vmem:[#allocation5 + $0x4b0] sm:$0xf0] }
  0xc1   :  { %v387_v26 = vmul.f32 0.010009766, %v379_v17  ;;  %v388_v27 = vmul.f32 0.010009766, %v380_v18  ;;  %v3554_v20 = vor.u32 %v4655_v7, %v3551_v10  ;;  %v4751_v6 = vld [vmem:[#allocation5 + $0x5a4] sm:$0xf]  ;;  %v3935_v7 = vld [vmem:[#allocation5 + $0x5b0] sm:$0xf0] }
  0xc2   :  { %v4639_v10 = vld [vmem:[#allocation5 + $0x224] sm:$0xf] }
  0xc3   :  { %v407_v36 = vmax.f32 %v379_v17, %v387_v26  ;;  %v408_v28 = vmax.f32 %v380_v18, %v388_v27  ;;  %v4571_v17 = vld [vmem:[#allocation5 + $0x4] sm:$0xf]  ;;  %v3215_v18 = vld [vmem:[#allocation5 + $0x10] sm:$0xf0] }
  0xc4   :  { %2064 = vmatpush.bf16.msrb.mxu0 %v3282_v16  ;;  %2077 = vmatpush.bf16.msrb.mxu1 %v3410_v21  ;;  %v3682_v21 = vor.u32 %v4687_v11, %v3679_v12  ;;  %v3535_v26 = vld [vmem:[#allocation5 + $0x290] sm:$0xf0]  ;;  %v4743_v32 = vld [vmem:[#allocation5 + $0x564] sm:$0xf] }
  0xc5   :  { %v5154_v41 = vpack.c.bf16 %v407_v36, %v407_v36  ;;  %v5156_v42 = vpack.c.bf16 %v408_v28, %v408_v28  ;;  %v3218_v36 = vor.u32 %v4571_v17, %v3215_v18  ;;  %v3346_v28 = vor.u32 %v4603_v19, %v3343_v23  ;;  %v3487_v11 = vld [vmem:[#allocation5 + $0x230] sm:$0xf0]  ;;  %v4747_v18 = vld [vmem:[#allocation5 + $0x584] sm:$0xf] }
  0xc6   :  { %v293_v40 = vpop.f32.mrf.mxu2  ;;  %v306_v47 = vpop.f32.mrf.mxu3  ;;  %v3791_v17 = vld [vmem:[#allocation5 + $0x490] sm:$0xf0] }
  0xc7   :  { %v313_v55 = vpack.c.bf16 %v306_v47, %v293_v40  ;;  %1991 = vmatmul.bf16.vlgmr.msrb.gmra.mxu2 %v5154_v41  ;;  %2004 = vmatmul.bf16.vlgmr.msrb.gmra.mxu3 %v5156_v42  ;;  %v3538_v40 = vor.u32 %v4651_v24, %v3535_v26  ;;  %v3970_v47 = vor.u32 %v4759_v34, %v3967_v35  ;;  %v3919_v19 = vld [vmem:[#allocation5 + $0x590] sm:$0xf0]  ;;  %v4667_v24 = vld [vmem:[#allocation5 + $0x304] sm:$0xf] }
  0xc8   :  { %2017 = vmatmul.bf16.vlgmr.msra.gmra.mxu0 %v5150_v29  ;;  %2030 = vmatmul.bf16.vlgmr.msra.gmra.mxu1 %v5152_v39  ;;  %v3471_v23 = vld [vmem:[#allocation5 + $0x210] sm:$0xf0]  ;;  %v4791_v34 = vld [vmem:[#allocation5 + $0x6e4] sm:$0xf] }
  0xc9   :  { %v355_v61 = vunpack.c.l.bf16 %v313_v55  ;;  %v356_v62 = vunpack.c.h.bf16 %v313_v55  ;;  %2065 = vmatpush.bf16.msrb.mxu0 %v3266_v43  ;;  %2078 = vmatpush.bf16.msrb.mxu1 %v3394_v44  ;;  %v3666_v43 = vor.u32 %v4683_v30, %v3663_v31  ;;  %v4647_v44 = vld [vmem:[#allocation5 + $0x264] sm:$0xf]  ;;  %v3823_v55 = vld [vmem:[#allocation5 + $0x4d0] sm:$0xf0] }
  0xca   :  { %2087 = vmatpush.bf16.msrb.mxu2 %v3586_v50  ;;  %2100 = vmatpush.bf16.msrb.mxu3 %v3714_v51  ;;  %v3522_v60 = vor.u32 %v4647_v44, %v3519_v45  ;;  %v4711_v30 = vld [vmem:[#allocation5 + $0x464] sm:$0xf]  ;;  %v3775_v31 = vld [vmem:[#allocation5 + $0x470] sm:$0xf0] }
  0xcb   :  { %v371_v8 = vadd.f32 %v363_v56, %v355_v61  ;;  %v372_v9 = vadd.f32 %v364_v57, %v356_v62  ;;  %v4755_v56 = vld [vmem:[#allocation5 + $0x5c4] sm:$0xf]  ;;  %v3951_v57 = vld [vmem:[#allocation5 + $0x5d0] sm:$0xf0]  ;;  %v3650_v61 = vor.u32 %v4679_v52, %v3647_v53 }
  0xcc   :  { %v4643_v62 = vld [vmem:[#allocation5 + $0x244] sm:$0xf]  ;;  %v3954_v1 = vor.u32 %v4755_v56, %v3951_v57  ;;  %v4095_v35 = vld [vmem:[#allocation5 + $0x6f0] sm:$0xf0] }
  0xcd   :  { %v376_v13 = vpack.c.bf16 %v372_v9, %v371_v8  ;;  %2066 = vmatpush.bf16.msrb.mxu0 %v3250_v63  ;;  %2079 = vmatpush.bf16.msrb.mxu1 %v3378_v0  ;;  %v3503_v63 = vld [vmem:[#allocation5 + $0x250] sm:$0xf0]  ;;  %v3826_v0 = vor.u32 %v4723_v54, %v3823_v55  ;;  %v4707_v44 = vld [vmem:[#allocation5 + $0x444] sm:$0xf] }
  0xce   :  { %v295_v16 = vpop.f32.mrf.mxu2  ;;  %2088 = vmatpush.bf16.msrb.mxu2 %v3570_v3  ;;  %2101 = vmatpush.bf16.msrb.mxu3 %v3698_v4  ;;  %v308_v22 = vpop.f32.mrf.mxu3  ;;  %v3631_v3 = vld [vmem:[#allocation5 + $0x350] sm:$0xf0]  ;;  %v4719_v4 = vld [vmem:[#allocation5 + $0x4a4] sm:$0xf]  ;;  %v3506_v8 = vor.u32 %v4643_v62, %v3503_v63 }
  0xcf   :  { %v383_v27 = vunpack.c.l.bf16 %v376_v13  ;;  %v384_v25 = vunpack.c.h.bf16 %v376_v13  ;;  %v3634_v9 = vor.u32 %v4675_v2, %v3631_v3  ;;  %v3810_v12 = vor.u32 %v4719_v4, %v3807_v5  ;;  %v4715_v16 = vld [vmem:[#allocation5 + $0x484] sm:$0xf]  ;;  %v3759_v45 = vld [vmem:[#allocation5 + $0x450] sm:$0xf0] }
  0xd0   :  { %v3938_v13 = vor.u32 %v4751_v6, %v3935_v7  ;;  %v4635_v22 = vld [vmem:[#allocation5 + $0x204] sm:$0xf]  ;;  %v3794_v26 = vor.u32 %v4715_v16, %v3791_v17  ;;  %v4079_v53 = vld [vmem:[#allocation5 + $0x6d0] sm:$0xf0]  ;;  %v3762_v56 = vor.u32 %v4707_v44, %v3759_v45 }
  0xd1   :  { %2067 = vmatpush.bf16.msrb.mxu0 %v3234_v14  ;;  %2080 = vmatpush.bf16.msrb.mxu1 %v3362_v15  ;;  %v391_v37 = vmul.f32 0.010009766, %v383_v27  ;;  %v392_v38 = vmul.f32 0.010009766, %v384_v25  ;;  %v4671_v14 = vld [vmem:[#allocation5 + $0x324] sm:$0xf]  ;;  %v3615_v15 = vld [vmem:[#allocation5 + $0x330] sm:$0xf0] }
  0xd2   :  { %2089 = vmatpush.bf16.msrb.mxu2 %v3554_v20  ;;  %2102 = vmatpush.bf16.msrb.mxu3 %v3682_v21  ;;  %v3490_v20 = vor.u32 %v4639_v10, %v3487_v11  ;;  %v3618_v21 = vor.u32 %v4671_v14, %v3615_v15  ;;  %v4787_v52 = vld [vmem:[#allocation5 + $0x6c4] sm:$0xf]  ;;  %v4207_v55 = vld [vmem:[#allocation5 + $0x7d0] sm:$0xf0] }
  0xd3   :  { %v411_v50 = vmax.f32 %v383_v27, %v391_v37  ;;  %v412_v51 = vmax.f32 %v384_v25, %v392_v38  ;;  %v3922_v27 = vor.u32 %v4747_v18, %v3919_v19  ;;  %v3599_v25 = vld [vmem:[#allocation5 + $0x310] sm:$0xf0]  ;;  %v3474_v37 = vor.u32 %v4635_v22, %v3471_v23  ;;  %v4819_v54 = vld [vmem:[#allocation5 + $0x7c4] sm:$0xf]  ;;  %v3333_v18 = vld [vmem:[#allocation5 + $0xe8] sm:$0xf] }
  0xd4   :  { %v3602_v38 = vor.u32 %v4667_v24, %v3599_v25  ;;  %v4082_v62 = vor.u32 %v4787_v52, %v4079_v53  ;;  %v4210_v63 = vor.u32 %v4819_v54, %v4207_v55  ;;  %v4783_v2 = vld [vmem:[#allocation5 + $0x6a4] sm:$0xf]  ;;  %v4063_v3 = vld [vmem:[#allocation5 + $0x6b0] sm:$0xf0]  ;;  %v4602_v19 = vld [vmem:[#allocation5 + $0xf4] sm:$0xf0] }
  0xd5   :  { %2068 = vmatpush.bf16.msrb.mxu0 %v3218_v36  ;;  %2081 = vmatpush.bf16.msrb.mxu1 %v3346_v28  ;;  %v5162_v58 = vpack.c.bf16 %v411_v50, %v411_v50  ;;  %v5164_v59 = vpack.c.bf16 %v412_v51, %v412_v51  ;;  %v4823_v36 = vld [vmem:[#allocation5 + $0x7e4] sm:$0xf]  ;;  %v4223_v28 = vld [vmem:[#allocation5 + $0x7f0] sm:$0xf0]  ;;  %v4066_v11 = vor.u32 %v4783_v2, %v4063_v3  ;;  %v3429_v52 = vld [vmem:[#allocation5 + $0x1a8] sm:$0xf] }
  0xd6   :  { %2090 = vmatpush.bf16.msrb.mxu2 %v3538_v40  ;;  %2103 = vmatpush.bf16.msrb.mxu3 %v3666_v43  ;;  %v3778_v40 = vor.u32 %v4711_v30, %v3775_v31  ;;  %v3906_v43 = vor.u32 %v4743_v32, %v3903_v33  ;;  %v4739_v50 = vld [vmem:[#allocation5 + $0x544] sm:$0xf]  ;;  %v3887_v51 = vld [vmem:[#allocation5 + $0x550] sm:$0xf0]  ;;  %v3334_v30 = vor.u32 %v4602_v19, %v3333_v18  ;;  %v4626_v53 = vld [vmem:[#allocation5 + $0x1b4] sm:$0xf0] }
  0xd7   :  { %2043 = vmatmul.bf16.vlgmr.msra.gmra.mxu2 %v5162_v58  ;;  %2056 = vmatmul.bf16.vlgmr.msra.gmra.mxu3 %v5164_v59  ;;  %v3890_v57 = vor.u32 %v4739_v50, %v3887_v51  ;;  %v4815_v4 = vld [vmem:[#allocation5 + $0x7a4] sm:$0xf]  ;;  %v4191_v5 = vld [vmem:[#allocation5 + $0x7b0] sm:$0xf0]  ;;  %v3301_v50 = vld [vmem:[#allocation5 + $0xa8] sm:$0xf] }
  0xd8   :  { %2069 = vmatmul.bf16.vlgmr.msrb.gmra.mxu0 %v5140_v48  ;;  %2082 = vmatmul.bf16.vlgmr.msrb.gmra.mxu1 %v5142_v49  ;;  %v4731_v10 = vld [vmem:[#allocation5 + $0x504] sm:$0xf]  ;;  %v4047_v15 = vld [vmem:[#allocation5 + $0x690] sm:$0xf0]  ;;  %v4594_v51 = vld [vmem:[#allocation5 + $0xb4] sm:$0xf0] }
  0xd9   :  { %2113 = vmatpush.bf16.msra.mxu0 %v3842_v46  ;;  %2126 = vmatpush.bf16.msra.mxu1 %v3970_v47  ;;  %v4098_v46 = vor.u32 %v4791_v34, %v4095_v35  ;;  %v4226_v47 = vor.u32 %v4823_v36, %v4223_v28  ;;  %v4779_v14 = vld [vmem:[#allocation5 + $0x684] sm:$0xf]  ;;  %v4175_v17 = vld [vmem:[#allocation5 + $0x790] sm:$0xf0]  ;;  %v3317_v34 = vld [vmem:[#allocation5 + $0xc8] sm:$0xf] }
  0xda   :  { %2091 = vmatpush.bf16.msrb.mxu2 %v3522_v60  ;;  %2104 = vmatpush.bf16.msrb.mxu3 %v3650_v61  ;;  %v4703_v60 = vld [vmem:[#allocation5 + $0x424] sm:$0xf]  ;;  %v3743_v61 = vld [vmem:[#allocation5 + $0x430] sm:$0xf0]  ;;  %v4050_v24 = vor.u32 %v4779_v14, %v4047_v15  ;;  %v4598_v35 = vld [vmem:[#allocation5 + $0xd4] sm:$0xf0] }
  0xdb   :  { %v3746_v6 = vor.u32 %v4703_v60, %v3743_v61  ;;  %v4811_v16 = vld [vmem:[#allocation5 + $0x784] sm:$0xf]  ;;  %v4031_v25 = vld [vmem:[#allocation5 + $0x670] sm:$0xf0]  ;;  %v3445_v36 = vld [vmem:[#allocation5 + $0x1c8] sm:$0xf]  ;;  %v3318_v44 = vor.u32 %v4598_v35, %v3317_v34  ;;  %v3302_v60 = vor.u32 %v4594_v51, %v3301_v50  ;;  %v3430_v61 = vor.u32 %v4626_v53, %v3429_v52 }
  0xdc   :  { %v4807_v32 = vld [vmem:[#allocation5 + $0x764] sm:$0xf]  ;;  %v4159_v33 = vld [vmem:[#allocation5 + $0x770] sm:$0xf0]  ;;  %v4630_v28 = vld [vmem:[#allocation5 + $0x1d4] sm:$0xf0] }
  0xdd   :  { %2114 = vmatpush.bf16.msra.mxu0 %v3826_v0  ;;  %2127 = vmatpush.bf16.msra.mxu1 %v3954_v1  ;;  %v4735_v0 = vld [vmem:[#allocation5 + $0x524] sm:$0xf]  ;;  %v3871_v1 = vld [vmem:[#allocation5 + $0x530] sm:$0xf0]  ;;  %v3446_v45 = vor.u32 %v4630_v28, %v3445_v36  ;;  %v3413_v2 = vld [vmem:[#allocation5 + $0x188] sm:$0xf] }
  0xde   :  { %2092 = vmatpush.bf16.msrb.mxu2 %v3506_v8  ;;  %2105 = vmatpush.bf16.msrb.mxu3 %v3634_v9  ;;  %v3874_v7 = vor.u32 %v4735_v0, %v3871_v1  ;;  %v4699_v8 = vld [vmem:[#allocation5 + $0x404] sm:$0xf]  ;;  %v3727_v9 = vld [vmem:[#allocation5 + $0x410] sm:$0xf0]  ;;  %v3285_v0 = vld [vmem:[#allocation5 + $0x88] sm:$0xf] }
  0xdf   :  { %v3730_v22 = vor.u32 %v4699_v8, %v3727_v9  ;;  %v4590_v1 = vld [vmem:[#allocation5 + $0x94] sm:$0xf0]  ;;  %v4795_v8 = vld [vmem:[#allocation5 + $0x704] sm:$0xf]  ;;  %v3397_v14 = vld [vmem:[#allocation5 + $0x168] sm:$0xf] }
  0xe0   :  { %v4622_v3 = vld [vmem:[#allocation5 + $0x194] sm:$0xf0]  ;;  %v3286_v9 = vor.u32 %v4590_v1, %v3285_v0  ;;  %v3717_v18 = vld [vmem:[#allocation5 + $0x3e8] sm:$0xf] }
  0xe1   :  { %2115 = vmatpush.bf16.msra.mxu0 %v3810_v12  ;;  %2128 = vmatpush.bf16.msra.mxu1 %v3938_v13  ;;  %v4194_v12 = vor.u32 %v4815_v4, %v4191_v5  ;;  %v3855_v13 = vld [vmem:[#allocation5 + $0x510] sm:$0xf0]  ;;  %v4618_v15 = vld [vmem:[#allocation5 + $0x174] sm:$0xf0]  ;;  %v3701_v34 = vld [vmem:[#allocation5 + $0x3c8] sm:$0xf] }
  0xe2   :  { %2093 = vmatpush.bf16.msrb.mxu2 %v3490_v20  ;;  %2106 = vmatpush.bf16.msrb.mxu3 %v3618_v21  ;;  %v3461_v20 = vld [vmem:[#allocation5 + $0x1e8] sm:$0xf]  ;;  %v4634_v21 = vld [vmem:[#allocation5 + $0x1f4] sm:$0xf0]  ;;  %v3858_v23 = vor.u32 %v4731_v10, %v3855_v13  ;;  %v3414_v10 = vor.u32 %v4622_v3, %v3413_v2 }
  0xe3   :  { %v3462_v31 = vor.u32 %v4634_v21, %v3461_v20  ;;  %v4586_v13 = vld [vmem:[#allocation5 + $0x74] sm:$0xf0]  ;;  %v3685_v50 = vld [vmem:[#allocation5 + $0x3a8] sm:$0xf] }
  0xe4   :  { %v4698_v19 = vld [vmem:[#allocation5 + $0x3f4] sm:$0xf0]  ;;  %v3669_v0 = vld [vmem:[#allocation5 + $0x388] sm:$0xf] }
  0xe5   :  { %2116 = vmatpush.bf16.msra.mxu0 %v3794_v26  ;;  %2129 = vmatpush.bf16.msra.mxu1 %v3922_v27  ;;  %v4178_v26 = vor.u32 %v4811_v16, %v4175_v17  ;;  %v4775_v27 = vld [vmem:[#allocation5 + $0x664] sm:$0xf]  ;;  %v3589_v16 = vld [vmem:[#allocation5 + $0x2e8] sm:$0xf]  ;;  %v4666_v17 = vld [vmem:[#allocation5 + $0x2f4] sm:$0xf0] }
  0xe6   :  { %2094 = vmatpush.bf16.msrb.mxu2 %v3474_v37  ;;  %2107 = vmatpush.bf16.msrb.mxu3 %v3602_v38  ;;  %v4034_v37 = vor.u32 %v4775_v27, %v4031_v25  ;;  %v4162_v38 = vor.u32 %v4807_v32, %v4159_v33  ;;  %v3590_v27 = vor.u32 %v4666_v17, %v3589_v16  ;;  %v3573_v32 = vld [vmem:[#allocation5 + $0x2c8] sm:$0xf]  ;;  %v4662_v33 = vld [vmem:[#allocation5 + $0x2d4] sm:$0xf0] }
  0xe7   :  { %v3718_v25 = vor.u32 %v4698_v19, %v3717_v18  ;;  %v4694_v35 = vld [vmem:[#allocation5 + $0x3d4] sm:$0xf0]  ;;  %v3845_v2 = vld [vmem:[#allocation5 + $0x4e8] sm:$0xf] }
  0xe8   :  { %v4690_v51 = vld [vmem:[#allocation5 + $0x3b4] sm:$0xf0]  ;;  %v3829_v16 = vld [vmem:[#allocation5 + $0x4c8] sm:$0xf] }
  0xe9   :  { %2117 = vmatpush.bf16.msra.mxu0 %v3778_v40  ;;  %2130 = vmatpush.bf16.msra.mxu1 %v3906_v43  ;;  %v4771_v40 = vld [vmem:[#allocation5 + $0x644] sm:$0xf]  ;;  %v4015_v43 = vld [vmem:[#allocation5 + $0x650] sm:$0xf0]  ;;  %v4686_v1 = vld [vmem:[#allocation5 + $0x394] sm:$0xf0] }
  0xea   :  { %2139 = vmatpush.bf16.msra.mxu2 %v4098_v46  ;;  %2152 = vmatpush.bf16.msra.mxu3 %v4226_v47  ;;  %v4803_v46 = vld [vmem:[#allocation5 + $0x744] sm:$0xf]  ;;  %v4143_v47 = vld [vmem:[#allocation5 + $0x750] sm:$0xf0]  ;;  %v4018_v54 = vor.u32 %v4771_v40, %v4015_v43  ;;  %v3574_v40 = vor.u32 %v4662_v33, %v3573_v32  ;;  %v3702_v43 = vor.u32 %v4694_v35, %v3701_v34  ;;  %v4730_v3 = vld [vmem:[#allocation5 + $0x4f4] sm:$0xf0] }
  0xeb   :  { %2095 = vmatmul.bf16.vlgmr.msrb.gmra.mxu2 %v5154_v41  ;;  %2108 = vmatmul.bf16.vlgmr.msrb.gmra.mxu3 %v5156_v42  ;;  %v4146_v55 = vor.u32 %v4803_v46, %v4143_v47  ;;  %v3557_v46 = vld [vmem:[#allocation5 + $0x2a8] sm:$0xf]  ;;  %v4658_v47 = vld [vmem:[#allocation5 + $0x2b4] sm:$0xf0] }
  0xec   :  { %v4726_v17 = vld [vmem:[#allocation5 + $0x4d4] sm:$0xf0]  ;;  %v3957_v18 = vld [vmem:[#allocation5 + $0x5c8] sm:$0xf] }
  0xed   :  { %2118 = vmatpush.bf16.msra.mxu0 %v3762_v56  ;;  %2131 = vmatpush.bf16.msra.mxu1 %v3890_v57  ;;  %v4767_v56 = vld [vmem:[#allocation5 + $0x624] sm:$0xf]  ;;  %v3999_v57 = vld [vmem:[#allocation5 + $0x630] sm:$0xf0]  ;;  %v4758_v19 = vld [vmem:[#allocation5 + $0x5d4] sm:$0xf0] }
  0xee   :  { %2140 = vmatpush.bf16.msra.mxu2 %v4082_v62  ;;  %2153 = vmatpush.bf16.msra.mxu3 %v4210_v63  ;;  %v4799_v62 = vld [vmem:[#allocation5 + $0x724] sm:$0xf]  ;;  %v4127_v63 = vld [vmem:[#allocation5 + $0x730] sm:$0xf0]  ;;  %v4002_v4 = vor.u32 %v4767_v56, %v3999_v57  ;;  %v3349_v56 = vld [vmem:[#allocation5 + $0x108] sm:$0xf]  ;;  %v3558_v57 = vor.u32 %v4658_v47, %v3557_v46 }
  0xef   :  { %v4130_v5 = vor.u32 %v4799_v62, %v4127_v63  ;;  %v3541_v62 = vld [vmem:[#allocation5 + $0x288] sm:$0xf]  ;;  %v4654_v63 = vld [vmem:[#allocation5 + $0x294] sm:$0xf0] }
  0xf0   :  { %v3941_v32 = vld [vmem:[#allocation5 + $0x5a8] sm:$0xf]  ;;  %v4754_v33 = vld [vmem:[#allocation5 + $0x5b4] sm:$0xf0] }
  0xf1   :  { %2119 = vmatpush.bf16.msra.mxu0 %v3746_v6  ;;  %2132 = vmatpush.bf16.msra.mxu1 %v3874_v7  ;;  %v4763_v6 = vld [vmem:[#allocation5 + $0x604] sm:$0xf]  ;;  %v3983_v7 = vld [vmem:[#allocation5 + $0x610] sm:$0xf0]  ;;  %v3925_v46 = vld [vmem:[#allocation5 + $0x588] sm:$0xf] }
  0xf2   :  { %2141 = vmatpush.bf16.msra.mxu2 %v4066_v11  ;;  %2154 = vmatpush.bf16.msra.mxu3 %v4194_v12  ;;  %v4111_v11 = vld [vmem:[#allocation5 + $0x710] sm:$0xf0]  ;;  %v3269_v12 = vld [vmem:[#allocation5 + $0x68] sm:$0xf]  ;;  %v3986_v20 = vor.u32 %v4763_v6, %v3983_v7  ;;  %v4750_v47 = vld [vmem:[#allocation5 + $0x594] sm:$0xf0] }
  0xf3   :  { %v4114_v21 = vor.u32 %v4795_v8, %v4111_v11  ;;  %v3542_v8 = vor.u32 %v4654_v63, %v3541_v62  ;;  %v4650_v11 = vld [vmem:[#allocation5 + $0x274] sm:$0xf0]  ;;  %v3909_v62 = vld [vmem:[#allocation5 + $0x568] sm:$0xf] }
  0xf4   :  { %v4746_v63 = vld [vmem:[#allocation5 + $0x574] sm:$0xf0] }
  0xf5   :  { %2120 = vmatpush.bf16.msra.mxu0 %v3730_v22  ;;  %2133 = vmatpush.bf16.msra.mxu1 %v3858_v23  ;;  %v3270_v22 = vor.u32 %v4586_v13, %v3269_v12  ;;  %v3398_v23 = vor.u32 %v4618_v15, %v3397_v14  ;;  %v3846_v12 = vor.u32 %v4730_v3, %v3845_v2  ;;  %v3653_v14 = vld [vmem:[#allocation5 + $0x368] sm:$0xf]  ;;  %v4682_v15 = vld [vmem:[#allocation5 + $0x374] sm:$0xf0] }
  0xf6   :  { %2142 = vmatpush.bf16.msra.mxu2 %v4050_v24  ;;  %2155 = vmatpush.bf16.msra.mxu3 %v4178_v26  ;;  %v3253_v24 = vld [vmem:[#allocation5 + $0x48] sm:$0xf]  ;;  %v4582_v26 = vld [vmem:[#allocation5 + $0x54] sm:$0xf0] }
  0xf7   :  { %v3254_v36 = vor.u32 %v4582_v26, %v3253_v24  ;;  %v3830_v24 = vor.u32 %v4726_v17, %v3829_v16  ;;  %v3958_v26 = vor.u32 %v4758_v19, %v3957_v18  ;;  %v4229_v2 = vld [vmem:[#allocation5 + $0x7e8] sm:$0xf]  ;;  %v4826_v3 = vld [vmem:[#allocation5 + $0x7f4] sm:$0xf0] }
  0xf8   :  { %2121 = vmatmul.bf16.vlgmr.msra.gmra.mxu0 %v5150_v29  ;;  %2134 = vmatmul.bf16.vlgmr.msra.gmra.mxu1 %v5152_v39  ;;  %v4213_v16 = vld [vmem:[#allocation5 + $0x7c8] sm:$0xf]  ;;  %v4822_v17 = vld [vmem:[#allocation5 + $0x7d4] sm:$0xf0] }
  0xf9   :  { %2165 = vmatpush.bf16.msrb.mxu0 %v3334_v30  ;;  %2178 = vmatpush.bf16.msrb.mxu1 %v3462_v31  ;;  %v3381_v30 = vld [vmem:[#allocation5 + $0x148] sm:$0xf]  ;;  %v4614_v31 = vld [vmem:[#allocation5 + $0x154] sm:$0xf0] }
  0xfa   :  { %2143 = vmatpush.bf16.msra.mxu2 %v4034_v37  ;;  %2156 = vmatpush.bf16.msra.mxu3 %v4162_v38  ;;  %v3382_v28 = vor.u32 %v4614_v31, %v3381_v30  ;;  %v3237_v37 = vld [vmem:[#allocation5 + $0x28] sm:$0xf]  ;;  %v4578_v38 = vld [vmem:[#allocation5 + $0x34] sm:$0xf0] }
  0xfb   :  { %v3238_v52 = vor.u32 %v4578_v38, %v3237_v37  ;;  %v3813_v30 = vld [vmem:[#allocation5 + $0x4a8] sm:$0xf]  ;;  %v4722_v31 = vld [vmem:[#allocation5 + $0x4b4] sm:$0xf0]  ;;  %v3942_v38 = vor.u32 %v4754_v33, %v3941_v32 }
  0xfc   :  { %v3814_v37 = vor.u32 %v4722_v31, %v3813_v30  ;;  %v4197_v30 = vld [vmem:[#allocation5 + $0x7a8] sm:$0xf]  ;;  %v4818_v31 = vld [vmem:[#allocation5 + $0x7b4] sm:$0xf0] }
  0xfd   :  { %2166 = vmatpush.bf16.msrb.mxu0 %v3318_v44  ;;  %2179 = vmatpush.bf16.msrb.mxu1 %v3446_v45  ;;  %v3365_v44 = vld [vmem:[#allocation5 + $0x128] sm:$0xf]  ;;  %v4610_v45 = vld [vmem:[#allocation5 + $0x134] sm:$0xf0] }
  0xfe   :  { %2144 = vmatpush.bf16.msra.mxu2 %v4018_v54  ;;  %2157 = vmatpush.bf16.msra.mxu3 %v4146_v55  ;;  %v3366_v53 = vor.u32 %v4610_v45, %v3365_v44  ;;  %v3221_v54 = vld [vmem:[#allocation5 + $0x8] sm:$0xf]  ;;  %v4574_v55 = vld [vmem:[#allocation5 + $0x14] sm:$0xf0] }
  0xff   :  { %v3222_v6 = vor.u32 %v4574_v55, %v3221_v54  ;;  %v3797_v44 = vld [vmem:[#allocation5 + $0x488] sm:$0xf]  ;;  %v4718_v45 = vld [vmem:[#allocation5 + $0x494] sm:$0xf0] }
 0x100   :  { %v3605_v54 = vld [vmem:[#allocation5 + $0x308] sm:$0xf]  ;;  %v3798_v55 = vor.u32 %v4718_v45, %v3797_v44  ;;  %v4814_v45 = vld [vmem:[#allocation5 + $0x794] sm:$0xf0] }
 0x101   :  { %2167 = vmatpush.bf16.msrb.mxu0 %v3302_v60  ;;  %2180 = vmatpush.bf16.msrb.mxu1 %v3430_v61  ;;  %v3686_v60 = vor.u32 %v4690_v51, %v3685_v50  ;;  %v4606_v61 = vld [vmem:[#allocation5 + $0x114] sm:$0xf0]  ;;  %v4181_v44 = vld [vmem:[#allocation5 + $0x788] sm:$0xf] }
 0x102   :  { %2145 = vmatpush.bf16.msra.mxu2 %v4002_v4  ;;  %2158 = vmatpush.bf16.msra.mxu3 %v4130_v5  ;;  %v3973_v4 = vld [vmem:[#allocation5 + $0x5e8] sm:$0xf]  ;;  %v4762_v5 = vld [vmem:[#allocation5 + $0x5f4] sm:$0xf0]  ;;  %v3350_v7 = vor.u32 %v4606_v61, %v3349_v56  ;;  %v3926_v56 = vor.u32 %v4750_v47, %v3925_v46  ;;  %v4600_v46 = vld [vmem:[#allocation5 + $0xec] sm:$0xf] }
 0x103   :  { %v3974_v13 = vor.u32 %v4762_v5, %v3973_v4  ;;  %v4714_v61 = vld [vmem:[#allocation5 + $0x474] sm:$0xf0]  ;;  %v3335_v47 = vld [vmem:[#allocation5 + $0xf8] sm:$0xf0] }
 0x105   :  { %2168 = vmatpush.bf16.msrb.mxu0 %v3286_v9  ;;  %2181 = vmatpush.bf16.msrb.mxu1 %v3414_v10  ;;  %v3670_v9 = vor.u32 %v4686_v1, %v3669_v0  ;;  %v3525_v10 = vld [vmem:[#allocation5 + $0x268] sm:$0xf]  ;;  %v4794_v1 = vld [vmem:[#allocation5 + $0x6f4] sm:$0xf0] }
 0x106   :  { %2146 = vmatpush.bf16.msra.mxu2 %v3986_v20  ;;  %2159 = vmatpush.bf16.msra.mxu3 %v4114_v21  ;;  %v3526_v20 = vor.u32 %v4650_v11, %v3525_v10  ;;  %v3654_v21 = vor.u32 %v4682_v15, %v3653_v14  ;;  %v4101_v0 = vld [vmem:[#allocation5 + $0x6e8] sm:$0xf]  ;;  %v4230_v11 = vor.u32 %v4826_v3, %v4229_v2  ;;  %v4790_v15 = vld [vmem:[#allocation5 + $0x6d4] sm:$0xf0]  ;;  %v4628_v2 = vld [vmem:[#allocation5 + $0x1cc] sm:$0xf] }
 0x107   :  { %v4102_v10 = vor.u32 %v4794_v1, %v4101_v0  ;;  %v4085_v14 = vld [vmem:[#allocation5 + $0x6c8] sm:$0xf]  ;;  %v4596_v0 = vld [vmem:[#allocation5 + $0xcc] sm:$0xf]  ;;  %v3319_v1 = vld [vmem:[#allocation5 + $0xd8] sm:$0xf0] }
 0x108   :  { %v3447_v3 = vld [vmem:[#allocation5 + $0x1d8] sm:$0xf0] }
 0x109   :  { %2169 = vmatpush.bf16.msrb.mxu0 %v3270_v22  ;;  %2182 = vmatpush.bf16.msrb.mxu1 %v3398_v23  ;;  %v3509_v22 = vld [vmem:[#allocation5 + $0x248] sm:$0xf]  ;;  %v4646_v23 = vld [vmem:[#allocation5 + $0x254] sm:$0xf0] }
 0x10a   :  { %2191 = vmatpush.bf16.msrb.mxu2 %v3590_v27  ;;  %2204 = vmatpush.bf16.msrb.mxu3 %v3718_v25  ;;  %v3637_v27 = vld [vmem:[#allocation5 + $0x348] sm:$0xf]  ;;  %v4678_v25 = vld [vmem:[#allocation5 + $0x354] sm:$0xf0]  ;;  %v3510_v34 = vor.u32 %v4646_v23, %v3509_v22  ;;  %v4086_v22 = vor.u32 %v4790_v15, %v4085_v14  ;;  %v4214_v23 = vor.u32 %v4822_v17, %v4213_v16  ;;  %v4624_v14 = vld [vmem:[#allocation5 + $0x1ac] sm:$0xf] }
 0x10b   :  { %2147 = vmatmul.bf16.vlgmr.msra.gmra.mxu2 %v5162_v58  ;;  %2160 = vmatmul.bf16.vlgmr.msra.gmra.mxu3 %v5164_v59  ;;  %v3638_v35 = vor.u32 %v4678_v25, %v3637_v27  ;;  %v4069_v27 = vld [vmem:[#allocation5 + $0x6a8] sm:$0xf]  ;;  %v4786_v25 = vld [vmem:[#allocation5 + $0x6b4] sm:$0xf0]  ;;  %v3431_v15 = vld [vmem:[#allocation5 + $0x1b8] sm:$0xf0] }
 0x10d   :  { %2170 = vmatpush.bf16.msrb.mxu0 %v3254_v36  ;;  %2183 = vmatpush.bf16.msrb.mxu1 %v3382_v28  ;;  %v3493_v36 = vld [vmem:[#allocation5 + $0x228] sm:$0xf]  ;;  %v4642_v28 = vld [vmem:[#allocation5 + $0x234] sm:$0xf0] }
 0x10e   :  { %2192 = vmatpush.bf16.msrb.mxu2 %v3574_v40  ;;  %2205 = vmatpush.bf16.msrb.mxu3 %v3702_v43  ;;  %v3621_v40 = vld [vmem:[#allocation5 + $0x328] sm:$0xf]  ;;  %v4674_v43 = vld [vmem:[#allocation5 + $0x334] sm:$0xf0]  ;;  %v3494_v50 = vor.u32 %v4642_v28, %v3493_v36  ;;  %v4070_v28 = vor.u32 %v4786_v25, %v4069_v27  ;;  %v4588_v25 = vld [vmem:[#allocation5 + $0x8c] sm:$0xf] }
 0x10f   :  { %v3622_v51 = vor.u32 %v4674_v43, %v3621_v40  ;;  %v3861_v36 = vld [vmem:[#allocation5 + $0x508] sm:$0xf]  ;;  %v4782_v43 = vld [vmem:[#allocation5 + $0x694] sm:$0xf0] }
 0x110   :  { %v4053_v40 = vld [vmem:[#allocation5 + $0x688] sm:$0xf]  ;;  %v4802_v27 = vld [vmem:[#allocation5 + $0x734] sm:$0xf0] }
 0x111   :  { %2171 = vmatpush.bf16.msrb.mxu0 %v3238_v52  ;;  %2184 = vmatpush.bf16.msrb.mxu1 %v3366_v53  ;;  %v3477_v52 = vld [vmem:[#allocation5 + $0x208] sm:$0xf]  ;;  %v4638_v53 = vld [vmem:[#allocation5 + $0x214] sm:$0xf0] }
 0x112   :  { %2193 = vmatpush.bf16.msrb.mxu2 %v3558_v57  ;;  %2206 = vmatpush.bf16.msrb.mxu3 %v3686_v60  ;;  %v4670_v57 = vld [vmem:[#allocation5 + $0x314] sm:$0xf0]  ;;  %v3781_v60 = vld [vmem:[#allocation5 + $0x468] sm:$0xf]  ;;  %v3478_v4 = vor.u32 %v4638_v53, %v3477_v52 }
 0x113   :  { %v3606_v5 = vor.u32 %v4670_v57, %v3605_v54  ;;  %v4054_v54 = vor.u32 %v4782_v43, %v4053_v40  ;;  %v4778_v57 = vld [vmem:[#allocation5 + $0x674] sm:$0xf0]  ;;  %v4584_v43 = vld [vmem:[#allocation5 + $0x6c] sm:$0xf] }
 0x114   :  { %v4798_v40 = vld [vmem:[#allocation5 + $0x714] sm:$0xf0] }
 0x115   :  { %2172 = vmatpush.bf16.msrb.mxu0 %v3222_v6  ;;  %2185 = vmatpush.bf16.msrb.mxu1 %v3350_v7  ;;  %v3782_v6 = vor.u32 %v4714_v61, %v3781_v60  ;;  %v3910_v7 = vor.u32 %v4746_v63, %v3909_v62  ;;  %v3338_v60 = vor.u32 %v4600_v46, %v3335_v47  ;;  %v4165_v62 = vld [vmem:[#allocation5 + $0x768] sm:$0xf]  ;;  %v4810_v63 = vld [vmem:[#allocation5 + $0x774] sm:$0xf0]  ;;  %v3399_v46 = vld [vmem:[#allocation5 + $0x178] sm:$0xf0] }
 0x116   :  { %2194 = vmatpush.bf16.msrb.mxu2 %v3542_v8  ;;  %2207 = vmatpush.bf16.msrb.mxu3 %v3670_v9  ;;  %v3765_v8 = vld [vmem:[#allocation5 + $0x448] sm:$0xf]  ;;  %v4710_v9 = vld [vmem:[#allocation5 + $0x454] sm:$0xf0]  ;;  %v4664_v47 = vld [vmem:[#allocation5 + $0x2ec] sm:$0xf] }
 0x117   :  { %v3766_v18 = vor.u32 %v4710_v9, %v3765_v8  ;;  %v3322_v8 = vor.u32 %v4596_v0, %v3319_v1  ;;  %v3450_v9 = vor.u32 %v4628_v2, %v3447_v3  ;;  %v4612_v1 = vld [vmem:[#allocation5 + $0x14c] sm:$0xf]  ;;  %v3383_v2 = vld [vmem:[#allocation5 + $0x158] sm:$0xf0] }
 0x118   :  { %2173 = vmatmul.bf16.vlgmr.msrb.gmra.mxu0 %v5140_v48  ;;  %2186 = vmatmul.bf16.vlgmr.msrb.gmra.mxu1 %v5142_v49  ;;  %v4660_v3 = vld [vmem:[#allocation5 + $0x2cc] sm:$0xf] }
 0x119   :  { %2217 = vmatpush.bf16.msra.mxu0 %v3846_v12  ;;  %2230 = vmatpush.bf16.msra.mxu1 %v3974_v13  ;;  %v3893_v12 = vld [vmem:[#allocation5 + $0x548] sm:$0xf]  ;;  %v4742_v13 = vld [vmem:[#allocation5 + $0x554] sm:$0xf0] }
 0x11a   :  { %2195 = vmatpush.bf16.msrb.mxu2 %v3526_v20  ;;  %2208 = vmatpush.bf16.msrb.mxu3 %v3654_v21  ;;  %v3894_v19 = vor.u32 %v4742_v13, %v3893_v12  ;;  %v3749_v20 = vld [vmem:[#allocation5 + $0x428] sm:$0xf]  ;;  %v4706_v21 = vld [vmem:[#allocation5 + $0x434] sm:$0xf0]  ;;  %v4592_v12 = vld [vmem:[#allocation5 + $0xac] sm:$0xf] }
 0x11b   :  { %v3750_v32 = vor.u32 %v4706_v21, %v3749_v20  ;;  %v3303_v13 = vld [vmem:[#allocation5 + $0xb8] sm:$0xf0]  ;;  %v4005_v20 = vld [vmem:[#allocation5 + $0x628] sm:$0xf]  ;;  %v4770_v21 = vld [vmem:[#allocation5 + $0x634] sm:$0xf0] }
 0x11d   :  { %2218 = vmatpush.bf16.msra.mxu0 %v3830_v24  ;;  %2231 = vmatpush.bf16.msra.mxu1 %v3958_v26  ;;  %v3877_v24 = vld [vmem:[#allocation5 + $0x528] sm:$0xf]  ;;  %v4738_v26 = vld [vmem:[#allocation5 + $0x534] sm:$0xf0] }
 0x11e   :  { %2196 = vmatpush.bf16.msrb.mxu2 %v3510_v34  ;;  %2209 = vmatpush.bf16.msrb.mxu3 %v3638_v35  ;;  %v3878_v33 = vor.u32 %v4738_v26, %v3877_v24  ;;  %v3733_v34 = vld [vmem:[#allocation5 + $0x408] sm:$0xf]  ;;  %v4702_v35 = vld [vmem:[#allocation5 + $0x414] sm:$0xf0] }
 0x11f   :  { %v3734_v52 = vor.u32 %v4702_v35, %v3733_v34  ;;  %v4133_v26 = vld [vmem:[#allocation5 + $0x728] sm:$0xf] }
 0x120   :  { %v4134_v34 = vor.u32 %v4802_v27, %v4133_v26  ;;  %v3989_v35 = vld [vmem:[#allocation5 + $0x608] sm:$0xf]  ;;  %v3223_v26 = vld [vmem:[#allocation5 + $0x18] sm:$0xf0]  ;;  %v4604_v27 = vld [vmem:[#allocation5 + $0x10c] sm:$0xf] }
 0x121   :  { %2219 = vmatpush.bf16.msra.mxu0 %v3814_v37  ;;  %2232 = vmatpush.bf16.msra.mxu1 %v3942_v38  ;;  %v4198_v37 = vor.u32 %v4818_v31, %v4197_v30  ;;  %v4734_v38 = vld [vmem:[#allocation5 + $0x514] sm:$0xf0]  ;;  %v3287_v30 = vld [vmem:[#allocation5 + $0x98] sm:$0xf0]  ;;  %v4620_v31 = vld [vmem:[#allocation5 + $0x18c] sm:$0xf] }
 0x122   :  { %2197 = vmatpush.bf16.msrb.mxu2 %v3494_v50  ;;  %2210 = vmatpush.bf16.msrb.mxu3 %v3622_v51  ;;  %v4632_v50 = vld [vmem:[#allocation5 + $0x1ec] sm:$0xf]  ;;  %v3463_v51 = vld [vmem:[#allocation5 + $0x1f8] sm:$0xf0]  ;;  %v3862_v53 = vor.u32 %v4734_v38, %v3861_v36  ;;  %v4766_v36 = vld [vmem:[#allocation5 + $0x614] sm:$0xf0] }
 0x123   :  { %v3466_v61 = vor.u32 %v4632_v50, %v3463_v51  ;;  %v3591_v50 = vld [vmem:[#allocation5 + $0x2f8] sm:$0xf0]  ;;  %v4696_v51 = vld [vmem:[#allocation5 + $0x3ec] sm:$0xf] }
 0x125   :  { %2220 = vmatpush.bf16.msra.mxu0 %v3798_v55  ;;  %2233 = vmatpush.bf16.msra.mxu1 %v3926_v56  ;;  %v4182_v55 = vor.u32 %v4814_v45, %v4181_v44  ;;  %v4037_v56 = vld [vmem:[#allocation5 + $0x668] sm:$0xf]  ;;  %v3271_v44 = vld [vmem:[#allocation5 + $0x78] sm:$0xf0]  ;;  %v4616_v45 = vld [vmem:[#allocation5 + $0x16c] sm:$0xf] }
 0x126   :  { %2198 = vmatpush.bf16.msrb.mxu2 %v3478_v4  ;;  %2211 = vmatpush.bf16.msrb.mxu3 %v3606_v5  ;;  %v4038_v4 = vor.u32 %v4778_v57, %v4037_v56  ;;  %v4166_v5 = vor.u32 %v4810_v63, %v4165_v62  ;;  %v3274_v57 = vor.u32 %v4584_v43, %v3271_v44  ;;  %v3255_v62 = vld [vmem:[#allocation5 + $0x58] sm:$0xf0] }
 0x127   :  { %v3594_v63 = vor.u32 %v4664_v47, %v3591_v50  ;;  %v4648_v50 = vld [vmem:[#allocation5 + $0x26c] sm:$0xf] }
 0x129   :  { %2221 = vmatpush.bf16.msra.mxu0 %v3782_v6  ;;  %2234 = vmatpush.bf16.msra.mxu1 %v3910_v7  ;;  %v4021_v6 = vld [vmem:[#allocation5 + $0x648] sm:$0xf]  ;;  %v4774_v7 = vld [vmem:[#allocation5 + $0x654] sm:$0xf0] }
 0x12a   :  { %2243 = vmatpush.bf16.msra.mxu2 %v4102_v10  ;;  %2256 = vmatpush.bf16.msra.mxu3 %v4230_v11  ;;  %v4149_v10 = vld [vmem:[#allocation5 + $0x748] sm:$0xf]  ;;  %v4806_v11 = vld [vmem:[#allocation5 + $0x754] sm:$0xf0]  ;;  %v4022_v16 = vor.u32 %v4774_v7, %v4021_v6  ;;  %v3703_v6 = vld [vmem:[#allocation5 + $0x3d8] sm:$0xf0] }
 0x12b   :  { %2199 = vmatmul.bf16.vlgmr.msrb.gmra.mxu2 %v5154_v41  ;;  %2212 = vmatmul.bf16.vlgmr.msrb.gmra.mxu3 %v5156_v42  ;;  %v4150_v17 = vor.u32 %v4806_v11, %v4149_v10  ;;  %v3239_v10 = vld [vmem:[#allocation5 + $0x38] sm:$0xf0] }
 0x12d   :  { %2222 = vmatpush.bf16.msra.mxu0 %v3766_v18  ;;  %2235 = vmatpush.bf16.msra.mxu1 %v3894_v19 }
 0x12e   :  { %2244 = vmatpush.bf16.msra.mxu2 %v4086_v22  ;;  %2257 = vmatpush.bf16.msra.mxu3 %v4214_v23  ;;  %v3306_v22 = vor.u32 %v4592_v12, %v3303_v13  ;;  %v3434_v23 = vor.u32 %v4624_v14, %v3431_v15  ;;  %v4608_v13 = vld [vmem:[#allocation5 + $0x12c] sm:$0xf]  ;;  %v3367_v14 = vld [vmem:[#allocation5 + $0x138] sm:$0xf0] }
 0x12f   :  { %v4656_v15 = vld [vmem:[#allocation5 + $0x2ac] sm:$0xf] }
 0x131   :  { %2223 = vmatpush.bf16.msra.mxu0 %v3750_v32  ;;  %2236 = vmatpush.bf16.msra.mxu1 %v3878_v33  ;;  %v3415_v32 = vld [vmem:[#allocation5 + $0x198] sm:$0xf0]  ;;  %v4006_v33 = vor.u32 %v4770_v21, %v4005_v20  ;;  %v3370_v20 = vor.u32 %v4608_v13, %v3367_v14 }
 0x132   :  { %2245 = vmatpush.bf16.msra.mxu2 %v4070_v28  ;;  %2258 = vmatpush.bf16.msra.mxu3 %v4198_v37  ;;  %v4117_v28 = vld [vmem:[#allocation5 + $0x708] sm:$0xf]  ;;  %v3290_v37 = vor.u32 %v4588_v25, %v3287_v30  ;;  %v3418_v38 = vor.u32 %v4620_v31, %v3415_v32  ;;  %v3351_v31 = vld [vmem:[#allocation5 + $0x118] sm:$0xf0]  ;;  %v4652_v32 = vld [vmem:[#allocation5 + $0x28c] sm:$0xf] }
 0x133   :  { %v3354_v43 = vor.u32 %v4604_v27, %v3351_v31  ;;  %v3943_v13 = vld [vmem:[#allocation5 + $0x5b8] sm:$0xf0] }
 0x134   :  { %v1966_v18 = vpop.f32.mrf.mxu0  ;;  %v1979_v19 = vpop.f32.mrf.mxu1  ;;  %v3799_v27 = vld [vmem:[#allocation5 + $0x498] sm:$0xf0] }
 0x135   :  { %2224 = vmatpush.bf16.msra.mxu0 %v3734_v52  ;;  %2237 = vmatpush.bf16.msra.mxu1 %v3862_v53  ;;  %v5182_v24 = vadd.f32 %v1979_v19, %v1966_v18  ;;  %v3719_v52 = vld [vmem:[#allocation5 + $0x3f8] sm:$0xf0]  ;;  %v3990_v53 = vor.u32 %v4766_v36, %v3989_v35  ;;  %v4728_v36 = vld [vmem:[#allocation5 + $0x4ec] sm:$0xf] }
 0x136   :  { %2246 = vmatpush.bf16.msra.mxu2 %v4054_v54  ;;  %2259 = vmatpush.bf16.msra.mxu3 %v4182_v55  ;;  %v4118_v54 = vor.u32 %v4798_v40, %v4117_v28  ;;  %v3722_v0 = vor.u32 %v4696_v51, %v3719_v52  ;;  %v3687_v18 = vld [vmem:[#allocation5 + $0x3b8] sm:$0xf0] }
 0x137   :  { %v3671_v35 = vld [vmem:[#allocation5 + $0x398] sm:$0xf0] }
 0x138   :  { %2225 = vmatmul.bf16.vlgmr.msra.gmra.mxu0 %v5150_v29  ;;  %2238 = vmatmul.bf16.vlgmr.msra.gmra.mxu1 %v5152_v39  ;;  %v3847_v28 = vld [vmem:[#allocation5 + $0x4f8] sm:$0xf0] }
 0x139   :  { %2269 = vmatpush.bf16.msrb.mxu0 %v3338_v60  ;;  %2282 = vmatpush.bf16.msrb.mxu1 %v3466_v61  ;;  %v3402_v60 = vor.u32 %v4616_v45, %v3399_v46  ;;  %v4580_v61 = vld [vmem:[#allocation5 + $0x4c] sm:$0xf]  ;;  %v3527_v51 = vld [vmem:[#allocation5 + $0x278] sm:$0xf0]  ;;  %v3850_v52 = vor.u32 %v4728_v36, %v3847_v28 }
 0x13a   :  { %2247 = vmatpush.bf16.msra.mxu2 %v4038_v4  ;;  %2260 = vmatpush.bf16.msra.mxu3 %v4166_v5  ;;  %v3575_v4 = vld [vmem:[#allocation5 + $0x2d8] sm:$0xf0]  ;;  %v4692_v5 = vld [vmem:[#allocation5 + $0x3cc] sm:$0xf]  ;;  %v3258_v7 = vor.u32 %v4580_v61, %v3255_v62 }
 0x13b   :  { %v3578_v11 = vor.u32 %v4660_v3, %v3575_v4  ;;  %v3706_v12 = vor.u32 %v4692_v5, %v3703_v6  ;;  %v4756_v61 = vld [vmem:[#allocation5 + $0x5cc] sm:$0xf]  ;;  %v3959_v62 = vld [vmem:[#allocation5 + $0x5d8] sm:$0xf0] }
 0x13c   :  { %v1968_v55 = vpop.f32.mrf.mxu0  ;;  %v1981_v56 = vpop.f32.mrf.mxu1  ;;  %v4644_v4 = vld [vmem:[#allocation5 + $0x24c] sm:$0xf]  ;;  %v3511_v5 = vld [vmem:[#allocation5 + $0x258] sm:$0xf0] }
 0x13d   :  { %2270 = vmatpush.bf16.msrb.mxu0 %v3322_v8  ;;  %2283 = vmatpush.bf16.msrb.mxu1 %v3450_v9  ;;  %v3386_v8 = vor.u32 %v4612_v1, %v3383_v2  ;;  %v4576_v9 = vld [vmem:[#allocation5 + $0x2c] sm:$0xf]  ;;  %v3655_v56 = vld [vmem:[#allocation5 + $0x378] sm:$0xf0]  ;;  %v3530_v2 = vor.u32 %v4648_v50, %v3527_v51 }
 0x13e   :  { %2248 = vmatpush.bf16.msra.mxu2 %v4022_v16  ;;  %2261 = vmatpush.bf16.msra.mxu3 %v4150_v17  ;;  %v3559_v16 = vld [vmem:[#allocation5 + $0x2b8] sm:$0xf0]  ;;  %v4688_v17 = vld [vmem:[#allocation5 + $0x3ac] sm:$0xf]  ;;  %v3242_v19 = vor.u32 %v4576_v9, %v3239_v10 }
 0x13f   :  { %v3562_v25 = vor.u32 %v4656_v15, %v3559_v16  ;;  %v3690_v30 = vor.u32 %v4688_v17, %v3687_v18  ;;  %v4680_v55 = vld [vmem:[#allocation5 + $0x36c] sm:$0xf]  ;;  %v3639_v9 = vld [vmem:[#allocation5 + $0x358] sm:$0xf0]  ;;  %v3514_v15 = vor.u32 %v4644_v4, %v3511_v5 }
 0x140   :  { %v3658_v3 = vor.u32 %v4680_v55, %v3655_v56  ;;  %v4720_v10 = vld [vmem:[#allocation5 + $0x4ac] sm:$0xf]  ;;  %v4231_v51 = vld [vmem:[#allocation5 + $0x7f8] sm:$0xf0] }
 0x141   :  { %2271 = vmatpush.bf16.msrb.mxu0 %v3306_v22  ;;  %2284 = vmatpush.bf16.msrb.mxu1 %v3434_v23  ;;  %v4572_v23 = vld [vmem:[#allocation5 + $0xc] sm:$0xf]  ;;  %v4215_v5 = vld [vmem:[#allocation5 + $0x7d8] sm:$0xf0] }
 0x142   :  { %2249 = vmatpush.bf16.msra.mxu2 %v4006_v33  ;;  %2262 = vmatpush.bf16.msra.mxu3 %v4134_v34  ;;  %v3543_v33 = vld [vmem:[#allocation5 + $0x298] sm:$0xf0]  ;;  %v4684_v34 = vld [vmem:[#allocation5 + $0x38c] sm:$0xf]  ;;  %v3226_v40 = vor.u32 %v4572_v23, %v3223_v26 }
 0x143   :  { %v3546_v44 = vor.u32 %v4652_v32, %v3543_v33  ;;  %v3674_v45 = vor.u32 %v4684_v34, %v3671_v35  ;;  %v3623_v26 = vld [vmem:[#allocation5 + $0x338] sm:$0xf0]  ;;  %v4636_v34 = vld [vmem:[#allocation5 + $0x20c] sm:$0xf] }
 0x144   :  { %v3479_v35 = vld [vmem:[#allocation5 + $0x218] sm:$0xf0]  ;;  %v4668_v36 = vld [vmem:[#allocation5 + $0x30c] sm:$0xf] }
 0x145   :  { %2272 = vmatpush.bf16.msrb.mxu0 %v3290_v37  ;;  %2285 = vmatpush.bf16.msrb.mxu1 %v3418_v38  ;;  %v2018_v21 = vpop.f32.mrf.mxu0  ;;  %v2031_v22 = vpop.f32.mrf.mxu1  ;;  %v4760_v37 = vld [vmem:[#allocation5 + $0x5ec] sm:$0xf]  ;;  %v3975_v38 = vld [vmem:[#allocation5 + $0x5f8] sm:$0xf0] }
 0x146   :  { %2250 = vmatpush.bf16.msra.mxu2 %v3990_v53  ;;  %2263 = vmatpush.bf16.msra.mxu3 %v4118_v54  ;;  %v3978_v53 = vor.u32 %v4760_v37, %v3975_v38  ;;  %v3607_v38 = vld [vmem:[#allocation5 + $0x318] sm:$0xf0]  ;;  %v4824_v50 = vld [vmem:[#allocation5 + $0x7ec] sm:$0xf] }
 0x147   :  { %v4820_v4 = vld [vmem:[#allocation5 + $0x7cc] sm:$0xf] }
 0x149   :  { %2273 = vmatpush.bf16.msrb.mxu0 %v3274_v57  ;;  %2286 = vmatpush.bf16.msrb.mxu1 %v3402_v60  ;;  %v4724_v57 = vld [vmem:[#allocation5 + $0x4cc] sm:$0xf]  ;;  %v3831_v60 = vld [vmem:[#allocation5 + $0x4d8] sm:$0xf0] }
 0x14a   :  { %2295 = vmatpush.bf16.msrb.mxu2 %v3594_v63  ;;  %2308 = vmatpush.bf16.msrb.mxu3 %v3722_v0  ;;  %v1992_v46 = vpop.f32.mrf.mxu2  ;;  %v2005_v47 = vpop.f32.mrf.mxu3  ;;  %v3834_v6 = vor.u32 %v4724_v57, %v3831_v60  ;;  %v4708_v60 = vld [vmem:[#allocation5 + $0x44c] sm:$0xf] }
 0x14b   :  { %2251 = vmatmul.bf16.vlgmr.msra.gmra.mxu2 %v5162_v58  ;;  %2264 = vmatmul.bf16.vlgmr.msra.gmra.mxu3 %v5164_v59  ;;  %v1993_v54 = vadd.f32 %v1992_v46, %v5182_v24  ;;  %v4792_v46 = vld [vmem:[#allocation5 + $0x6ec] sm:$0xf] }
 0x14d   :  { %2274 = vmatpush.bf16.msrb.mxu0 %v3258_v7  ;;  %2287 = vmatpush.bf16.msrb.mxu1 %v3386_v8  ;;  %v2006_v63 = vadd.f32 %v2005_v47, %v1993_v54  ;;  %v2020_v0 = vpop.f32.mrf.mxu0  ;;  %v2033_v1 = vpop.f32.mrf.mxu1  ;;  %v3962_v7 = vor.u32 %v4756_v61, %v3959_v62  ;;  %v4676_v8 = vld [vmem:[#allocation5 + $0x34c] sm:$0xf]  ;;  %v4103_v47 = vld [vmem:[#allocation5 + $0x6f8] sm:$0xf0] }
 0x14e   :  { %2296 = vmatpush.bf16.msrb.mxu2 %v3578_v11  ;;  %2309 = vmatpush.bf16.msrb.mxu3 %v3706_v12  ;;  %v3815_v11 = vld [vmem:[#allocation5 + $0x4b8] sm:$0xf0]  ;;  %v4752_v12 = vld [vmem:[#allocation5 + $0x5ac] sm:$0xf]  ;;  %v3642_v16 = vor.u32 %v4676_v8, %v3639_v9  ;;  %v4106_v62 = vor.u32 %v4792_v46, %v4103_v47 }
 0x14f   :  { %v2019_v24 = vadd.f32 %v2018_v21, %v2006_v63  ;;  %v3818_v21 = vor.u32 %v4720_v10, %v3815_v11  ;;  %v3946_v23 = vor.u32 %v4752_v12, %v3943_v13  ;;  %v3767_v61 = vld [vmem:[#allocation5 + $0x458] sm:$0xf0]  ;;  %v4234_v63 = vor.u32 %v4824_v50, %v4231_v51  ;;  %v4740_v0 = vld [vmem:[#allocation5 + $0x54c] sm:$0xf] }
 0x150   :  { %v3895_v1 = vld [vmem:[#allocation5 + $0x558] sm:$0xf0]  ;;  %v4704_v9 = vld [vmem:[#allocation5 + $0x42c] sm:$0xf]  ;;  %v4218_v12 = vor.u32 %v4820_v4, %v4215_v5 }
 0x151   :  { %2275 = vmatpush.bf16.msrb.mxu0 %v3242_v19  ;;  %2288 = vmatpush.bf16.msrb.mxu1 %v3370_v20  ;;  %v5189_v14 = vadd.f32 %v2031_v22, %v2019_v24  ;;  %v4640_v19 = vld [vmem:[#allocation5 + $0x22c] sm:$0xf]  ;;  %v3495_v20 = vld [vmem:[#allocation5 + $0x238] sm:$0xf0]  ;;  %v3898_v8 = vor.u32 %v4740_v0, %v3895_v1 }
 0x152   :  { %2297 = vmatpush.bf16.msrb.mxu2 %v3562_v25  ;;  %2310 = vmatpush.bf16.msrb.mxu3 %v3690_v30  ;;  %v1994_v17 = vpop.f32.mrf.mxu2  ;;  %v2007_v18 = vpop.f32.mrf.mxu3  ;;  %v4748_v25 = vld [vmem:[#allocation5 + $0x58c] sm:$0xf]  ;;  %v3927_v30 = vld [vmem:[#allocation5 + $0x598] sm:$0xf0]  ;;  %v3498_v22 = vor.u32 %v4640_v19, %v3495_v20 }
 0x153   :  { %v3930_v37 = vor.u32 %v4748_v25, %v3927_v30  ;;  %v3751_v10 = vld [vmem:[#allocation5 + $0x438] sm:$0xf0]  ;;  %v4736_v13 = vld [vmem:[#allocation5 + $0x52c] sm:$0xf] }
 0x154   :  { %v4071_v17 = vld [vmem:[#allocation5 + $0x6b8] sm:$0xf0]  ;;  %v4816_v18 = vld [vmem:[#allocation5 + $0x7ac] sm:$0xf]  ;;  %v3754_v20 = vor.u32 %v4704_v9, %v3751_v10  ;;  %v4854_v9 = vld [vmem:[#allocation7 + $0xd4] sm:$0xf0] }
 0x155   :  { %2276 = vmatpush.bf16.msrb.mxu0 %v3226_v40  ;;  %2289 = vmatpush.bf16.msrb.mxu1 %v3354_v43  ;;  %v5191_v32 = vpop.f32.mrf.mxu0  ;;  %v5193_v33 = vpop.f32.mrf.mxu1  ;;  %v4712_v40 = vld [vmem:[#allocation5 + $0x46c] sm:$0xf]  ;;  %v3783_v43 = vld [vmem:[#allocation5 + $0x478] sm:$0xf0] }
 0x156   :  { %2298 = vmatpush.bf16.msrb.mxu2 %v3546_v44  ;;  %2311 = vmatpush.bf16.msrb.mxu3 %v3674_v45  ;;  %v4744_v44 = vld [vmem:[#allocation5 + $0x56c] sm:$0xf]  ;;  %v3911_v45 = vld [vmem:[#allocation5 + $0x578] sm:$0xf0]  ;;  %v3786_v54 = vor.u32 %v4712_v40, %v3783_v43 }
 0x157   :  { %v3914_v55 = vor.u32 %v4744_v44, %v3911_v45  ;;  %v4199_v19 = vld [vmem:[#allocation5 + $0x7b8] sm:$0xf0]  ;;  %v4776_v45 = vld [vmem:[#allocation5 + $0x66c] sm:$0xf] }
 0x158   :  { %2277 = vmatmul.bf16.vlgmr.msrb.gmra.mxu0 %v5140_v48  ;;  %2290 = vmatmul.bf16.vlgmr.msrb.gmra.mxu1 %v5142_v49  ;;  %v4672_v48 = vld [vmem:[#allocation5 + $0x32c] sm:$0xf]  ;;  %v4202_v30 = vor.u32 %v4816_v18, %v4199_v19  ;;  %v4039_v46 = vld [vmem:[#allocation5 + $0x678] sm:$0xf0]  ;;  %v4269_v19 = vld [vmem:[#allocation7 + $0x40] sm:$0xf] }
 0x159   :  { %2321 = vmatpush.bf16.msra.mxu0 %v3850_v52  ;;  %2334 = vmatpush.bf16.msra.mxu1 %v3978_v53  ;;  %v4716_v49 = vld [vmem:[#allocation5 + $0x48c] sm:$0xf]  ;;  %v3626_v31 = vor.u32 %v4672_v48, %v3623_v26  ;;  %v3482_v52 = vor.u32 %v4636_v34, %v3479_v35  ;;  %v3610_v53 = vor.u32 %v4668_v36, %v3607_v38  ;;  %v4183_v34 = vld [vmem:[#allocation5 + $0x798] sm:$0xf0]  ;;  %v4293_v35 = vld [vmem:[#allocation7 + $0x70] sm:$0xf] }
 0x15a   :  { %2299 = vmatpush.bf16.msrb.mxu2 %v3530_v2  ;;  %2312 = vmatpush.bf16.msrb.mxu3 %v3658_v3  ;;  %v3802_v28 = vor.u32 %v4716_v49, %v3799_v27  ;;  %v5195_v56 = vpop.f32.mrf.mxu2  ;;  %v5197_v57 = vpop.f32.mrf.mxu3  ;;  %v4788_v2 = vld [vmem:[#allocation5 + $0x6cc] sm:$0xf]  ;;  %v4087_v3 = vld [vmem:[#allocation5 + $0x6d8] sm:$0xf0]  ;;  %v4842_v36 = vld [vmem:[#allocation7 + $0x74] sm:$0xf0] }
 0x15b   :  { %v4090_v11 = vor.u32 %v4788_v2, %v4087_v3  ;;  %v4700_v26 = vld [vmem:[#allocation5 + $0x40c] sm:$0xf]  ;;  %v3735_v49 = vld [vmem:[#allocation5 + $0x418] sm:$0xf0]  ;;  %v4294_v51 = vor.u32 %v4842_v36, %v4293_v35  ;;  %v4834_v35 = vld [vmem:[#allocation7 + $0x34] sm:$0xf0] }
 0x15c   :  { %v4732_v27 = vld [vmem:[#allocation5 + $0x50c] sm:$0xf]  ;;  %v3738_v38 = vor.u32 %v4700_v26, %v3735_v49  ;;  %v4167_v50 = vld [vmem:[#allocation5 + $0x778] sm:$0xf0]  ;;  %v4325_v36 = vld [vmem:[#allocation7 + $0xb0] sm:$0xf] }
 0x15d   :  { %2322 = vmatpush.bf16.msra.mxu0 %v3834_v6  ;;  %2335 = vmatpush.bf16.msra.mxu1 %v3962_v7  ;;  %v2072_v24 = vpop.f32.mrf.mxu0  ;;  %v2085_v6 = vpop.f32.mrf.mxu1  ;;  %v3770_v7 = vor.u32 %v4708_v60, %v3767_v61  ;;  %v4808_v47 = vld [vmem:[#allocation5 + $0x76c] sm:$0xf]  ;;  %v4856_v60 = vld [vmem:[#allocation7 + $0xe4] sm:$0xf0]  ;;  %v4042_v61 = vor.u32 %v4776_v45, %v4039_v46  ;;  %v4023_v2 = vld [vmem:[#allocation5 + $0x658] sm:$0xf0] }
 0x15e   :  { %2300 = vmatpush.bf16.msrb.mxu2 %v3514_v15  ;;  %2313 = vmatpush.bf16.msrb.mxu3 %v3642_v16  ;;  %v3879_v15 = vld [vmem:[#allocation5 + $0x538] sm:$0xf0]  ;;  %v4784_v16 = vld [vmem:[#allocation5 + $0x6ac] sm:$0xf]  ;;  %v4277_v6 = vld [vmem:[#allocation7 + $0x50] sm:$0xf] }
 0x15f   :  { %v4074_v25 = vor.u32 %v4784_v16, %v4071_v17  ;;  %v4772_v1 = vld [vmem:[#allocation5 + $0x64c] sm:$0xf]  ;;  %v4151_v4 = vld [vmem:[#allocation5 + $0x758] sm:$0xf0]  ;;  %v4832_v45 = vld [vmem:[#allocation7 + $0x24] sm:$0xf0] }
 0x160   :  { %v4804_v3 = vld [vmem:[#allocation5 + $0x74c] sm:$0xf]  ;;  %v4026_v10 = vor.u32 %v4772_v1, %v4023_v2  ;;  %v4135_v16 = vld [vmem:[#allocation5 + $0x738] sm:$0xf0]  ;;  %v4317_v46 = vld [vmem:[#allocation7 + $0xa0] sm:$0xf] }
 0x161   :  { %2323 = vmatpush.bf16.msra.mxu0 %v3818_v21  ;;  %2336 = vmatpush.bf16.msra.mxu1 %v3946_v23  ;;  %v3882_v21 = vor.u32 %v4736_v13, %v3879_v15  ;;  %v4007_v13 = vld [vmem:[#allocation5 + $0x638] sm:$0xf0]  ;;  %v4800_v15 = vld [vmem:[#allocation5 + $0x72c] sm:$0xf] }
 0x162   :  { %2301 = vmatpush.bf16.msrb.mxu2 %v3498_v22  ;;  %2314 = vmatpush.bf16.msrb.mxu3 %v3626_v31  ;;  %v2046_v23 = vpop.f32.mrf.mxu2  ;;  %v2059_v48 = vpop.f32.mrf.mxu3  ;;  %v3863_v22 = vld [vmem:[#allocation5 + $0x518] sm:$0xf0]  ;;  %v4138_v26 = vor.u32 %v4800_v15, %v4135_v16 }
 0x163   :  { %v4055_v31 = vld [vmem:[#allocation5 + $0x698] sm:$0xf0]  ;;  %v3866_v40 = vor.u32 %v4732_v27, %v3863_v22  ;;  %v4796_v22 = vld [vmem:[#allocation5 + $0x70c] sm:$0xf] }
 0x164   :  { %v2378_v2 = vld [vmem:[#allocation1] sm:$0xff] }
 0x165   :  { %2324 = vmatpush.bf16.msra.mxu0 %v3802_v28  ;;  %2337 = vmatpush.bf16.msra.mxu1 %v3930_v37  ;;  %v4357_v28 = vld [vmem:[#allocation7 + $0xf0] sm:$0xf]  ;;  %v4858_v37 = vld [vmem:[#allocation7 + $0xf4] sm:$0xf0] }
 0x166   :  { %2302 = vmatpush.bf16.msrb.mxu2 %v3482_v52  ;;  %2315 = vmatpush.bf16.msrb.mxu3 %v3610_v53  ;;  %v4358_v52 = vor.u32 %v4858_v37, %v4357_v28  ;;  %v4285_v53 = vld [vmem:[#allocation7 + $0x60] sm:$0xf]  ;;  %v4850_v28 = vld [vmem:[#allocation7 + $0xb4] sm:$0xf0] }
 0x169   :  { %2325 = vmatpush.bf16.msra.mxu0 %v3786_v54  ;;  %2338 = vmatpush.bf16.msra.mxu1 %v3914_v55  ;;  %v4840_v54 = vld [vmem:[#allocation7 + $0x64] sm:$0xf0]  ;;  %v4349_v55 = vld [vmem:[#allocation7 + $0xe0] sm:$0xf] }
 0x16a   :  { %2347 = vmatpush.bf16.msra.mxu2 %v4106_v62  ;;  %2360 = vmatpush.bf16.msra.mxu3 %v4234_v63  ;;  %v4170_v62 = vor.u32 %v4808_v47, %v4167_v50  ;;  %v4286_v5 = vor.u32 %v4840_v54, %v4285_v53  ;;  %v4350_v24 = vor.u32 %v4856_v60, %v4349_v55  ;;  %v4848_v47 = vld [vmem:[#allocation7 + $0xa4] sm:$0xf0]  ;;  %v4245_v55 = vld [vmem:[#allocation7 + $0x10] sm:$0xf]  ;;  %v4830_v60 = vld [vmem:[#allocation7 + $0x14] sm:$0xf0] }
 0x16b   :  { %2303 = vmatmul.bf16.vlgmr.msrb.gmra.mxu2 %v5154_v41  ;;  %2316 = vmatmul.bf16.vlgmr.msrb.gmra.mxu3 %v5156_v42  ;;  %v4780_v41 = vld [vmem:[#allocation5 + $0x68c] sm:$0xf]  ;;  %v4318_v54 = vor.u32 %v4848_v47, %v4317_v46 }
 0x16c   :  { %v4812_v42 = vld [vmem:[#allocation5 + $0x78c] sm:$0xf]  ;;  %v4058_v43 = vor.u32 %v4780_v41, %v4055_v31  ;;  %v4119_v41 = vld [vmem:[#allocation5 + $0x718] sm:$0xf0] }
 0x16d   :  { %2326 = vmatpush.bf16.msra.mxu0 %v3770_v7  ;;  %2339 = vmatpush.bf16.msra.mxu1 %v3898_v8  ;;  %v4186_v44 = vor.u32 %v4812_v42, %v4183_v34  ;;  %v4838_v7 = vld [vmem:[#allocation7 + $0x54] sm:$0xf0]  ;;  %v4341_v8 = vld [vmem:[#allocation7 + $0xd0] sm:$0xf] }
 0x16e   :  { %2348 = vmatpush.bf16.msra.mxu2 %v4090_v11  ;;  %2361 = vmatpush.bf16.msra.mxu3 %v4218_v12  ;;  %v5201_v63 = vpop.f32.mrf.mxu2  ;;  %v5203_v0 = vpop.f32.mrf.mxu3  ;;  %v4154_v11 = vor.u32 %v4804_v3, %v4151_v4  ;;  %v4768_v12 = vld [vmem:[#allocation5 + $0x62c] sm:$0xf]  ;;  %v4278_v17 = vor.u32 %v4838_v7, %v4277_v6  ;;  %v4342_v18 = vor.u32 %v4854_v9, %v4341_v8  ;;  %v4261_v34 = vld [vmem:[#allocation7 + $0x30] sm:$0xf]  ;;  %v2379_v3 = vld [vmem:[#allocation1 + $0x9] sm:$0xff] }
 0x16f   :  { %v4010_v48 = vor.u32 %v4768_v12, %v4007_v13  ;;  %v4246_v4 = vor.u32 %v4830_v60, %v4245_v55  ;;  %v4844_v6 = vld [vmem:[#allocation7 + $0x84] sm:$0xf0]  ;;  %v4841_v7 = vld [vmem:[#allocation7 + $0x74] sm:$0xf]  ;;  %v4295_v9 = vld [vmem:[#allocation7 + $0x78] sm:$0xf0]  ;;  %v2382_v12 = vpack.i.b16 %v2378_v2, %v2378_v2  ;;  %v2385_v13 = vpack.i.b16 %v2379_v3, %v2379_v3 }
 0x170   :  { %v4298_v15 = vor.u32 %v4841_v7, %v4295_v9  ;;  %v4263_v60 = vld [vmem:[#allocation7 + $0x38] sm:$0xf0] }
 0x171   :  { %2327 = vmatpush.bf16.msra.mxu0 %v3754_v20  ;;  %2340 = vmatpush.bf16.msra.mxu1 %v3882_v21  ;;  %v4836_v20 = vld [vmem:[#allocation7 + $0x44] sm:$0xf0] }
 0x172   :  { %2349 = vmatpush.bf16.msra.mxu2 %v4074_v25  ;;  %2362 = vmatpush.bf16.msra.mxu3 %v4202_v30  ;;  %v4852_v21 = vld [vmem:[#allocation7 + $0xc4] sm:$0xf0]  ;;  %v4764_v25 = vld [vmem:[#allocation5 + $0x60c] sm:$0xf]  ;;  %v3991_v30 = vld [vmem:[#allocation5 + $0x618] sm:$0xf0]  ;;  %v4270_v31 = vor.u32 %v4836_v20, %v4269_v19 }
 0x173   :  { %v3994_v37 = vor.u32 %v4764_v25, %v3991_v30  ;;  %v4855_v19 = vld [vmem:[#allocation7 + $0xe4] sm:$0xf]  ;;  %v4351_v20 = vld [vmem:[#allocation7 + $0xe8] sm:$0xf0]  ;;  %v4837_v25 = vld [vmem:[#allocation7 + $0x54] sm:$0xf] }
 0x175   :  { %2328 = vmatpush.bf16.msra.mxu0 %v3738_v38  ;;  %2341 = vmatpush.bf16.msra.mxu1 %v3866_v40  ;;  %v5209_v23 = vpop.f32.mrf.mxu1  ;;  %v4122_v38 = vor.u32 %v4796_v22, %v4119_v41  ;;  %v4262_v40 = vor.u32 %v4834_v35, %v4261_v34  ;;  %v4279_v22 = vld [vmem:[#allocation7 + $0x58] sm:$0xf0]  ;;  %v4853_v41 = vld [vmem:[#allocation7 + $0xd4] sm:$0xf]  ;;  %v4835_v34 = vld [vmem:[#allocation7 + $0x44] sm:$0xf] }
 0x176   :  { %2350 = vmatpush.bf16.msra.mxu2 %v4058_v43  ;;  %2363 = vmatpush.bf16.msra.mxu3 %v4186_v44  ;;  %v2098_v49 = vpop.f32.mrf.mxu2  ;;  %v2111_v27 = vpop.f32.mrf.mxu3  ;;  %v4326_v43 = vor.u32 %v4850_v28, %v4325_v36  ;;  %v4253_v44 = vld [vmem:[#allocation7 + $0x20] sm:$0xf] }
 0x177   :  { %v4254_v53 = vor.u32 %v4832_v45, %v4253_v44  ;;  %v4354_v27 = vor.u32 %v4855_v19, %v4351_v20 }
 0x178   :  { %2329 = vmatmul.bf16.vlgmr.msra.gmra.mxu0 %v5150_v29  ;;  %2342 = vmatmul.bf16.vlgmr.msra.gmra.mxu1 %v5152_v39  ;;  %v4333_v29 = vld [vmem:[#allocation7 + $0xc0] sm:$0xf]  ;;  %v5207_v39 = vpop.f32.mrf.mxu0 }
 0x179   :  { %2814 = vmatpush.bf16.msrb.mxu0 %v4294_v51  ;;  %2827 = vmatpush.bf16.msrb.mxu1 %v4358_v52  ;;  %v4334_v42 = vor.u32 %v4852_v21, %v4333_v29  ;;  %v2084_v52 = vadd.f32 %v5193_v33, %v5191_v32  ;;  %v4237_v33 = vld [vmem:[#allocation7] sm:$0xf] }
 0x17a   :  { %2351 = vmatpush.bf16.msra.mxu2 %v4042_v61  ;;  %2364 = vmatpush.bf16.msra.mxu3 %v4170_v62  ;;  %v4309_v61 = vld [vmem:[#allocation7 + $0x90] sm:$0xf]  ;;  %v4846_v62 = vld [vmem:[#allocation7 + $0x94] sm:$0xf0] }
 0x17b   :  { %v2097_v1 = vadd.f32 %v5201_v63, %v2084_v52  ;;  %v4310_v32 = vor.u32 %v4846_v62, %v4309_v61  ;;  %v4359_v63 = vld [vmem:[#allocation7 + $0xf8] sm:$0xf0]  ;;  %v4849_v61 = vld [vmem:[#allocation7 + $0xb4] sm:$0xf] }
 0x17c   :  { %v4327_v62 = vld [vmem:[#allocation7 + $0xb8] sm:$0xf0] }
 0x17d   :  { %2815 = vmatpush.bf16.msrb.mxu0 %v4286_v5  ;;  %2828 = vmatpush.bf16.msrb.mxu1 %v4350_v24  ;;  %v2137_v51 = vpop.f32.mrf.mxu1  ;;  %v4828_v5 = vld [vmem:[#allocation7 + $0x4] sm:$0xf0]  ;;  %v4301_v24 = vld [vmem:[#allocation7 + $0x80] sm:$0xf]  ;;  %v2110_v8 = vadd.f32 %v5203_v0, %v2097_v1  ;;  %v2045_v0 = vadd.f32 %v5195_v56, %v5189_v14  ;;  %v4282_v56 = vor.u32 %v4837_v25, %v4279_v22 }
 0x17e   :  { %2352 = vmatpush.bf16.msra.mxu2 %v4026_v10  ;;  %2365 = vmatpush.bf16.msra.mxu3 %v4154_v11  ;;  %v4857_v10 = vld [vmem:[#allocation7 + $0xf4] sm:$0xf]  ;;  %v4302_v11 = vor.u32 %v4844_v6, %v4301_v24  ;;  %v4330_v3 = vor.u32 %v4849_v61, %v4327_v62  ;;  %v4847_v24 = vld [vmem:[#allocation7 + $0xa4] sm:$0xf]  ;;  %v4319_v6 = vld [vmem:[#allocation7 + $0xa8] sm:$0xf0] }
 0x17f   :  { %v4362_v16 = vor.u32 %v4857_v10, %v4359_v63  ;;  %v4870_v61 = vld [vmem:[#allocation7 + $0x154] sm:$0xf0]  ;;  %v4469_v62 = vld [vmem:[#allocation7 + $0x1d0] sm:$0xf] }
 0x180   :  { %v2124_v50 = vpop.f32.mrf.mxu0 }
 0x181   :  { %2816 = vmatpush.bf16.msrb.mxu0 %v4278_v17  ;;  %2829 = vmatpush.bf16.msrb.mxu1 %v4342_v18  ;;  %v4839_v17 = vld [vmem:[#allocation7 + $0x64] sm:$0xf]  ;;  %v4287_v18 = vld [vmem:[#allocation7 + $0x68] sm:$0xf0] }
 0x182   :  { %2353 = vmatpush.bf16.msra.mxu2 %v4010_v48  ;;  %2366 = vmatpush.bf16.msra.mxu3 %v4138_v26  ;;  %v2384_v48 = vperm.slane %v2382_v12, 0  ;;  %v2387_v26 = vperm.slane %v2385_v13, 0  ;;  %v4290_v49 = vor.u32 %v4839_v17, %v4287_v18  ;;  %v4247_v13 = vld [vmem:[#allocation7 + $0x18] sm:$0xf0] }
 0x184   :  { %v2398_v36 = vunpack.c.l.bf16 %v2384_v48  ;;  %v2399_v28 = vunpack.c.l.bf16 %v2387_v26 }
 0x185   :  { %2817 = vmatpush.bf16.msrb.mxu0 %v4270_v31  ;;  %2830 = vmatpush.bf16.msrb.mxu1 %v4334_v42  ;;  %v4343_v31 = vld [vmem:[#allocation7 + $0xd8] sm:$0xf0]  ;;  %v2058_v42 = vadd.f32 %v5197_v57, %v2045_v0  ;;  %v4827_v0 = vld [vmem:[#allocation7 + $0x4] sm:$0xf] }
 0x186   :  { %2354 = vmatpush.bf16.msra.mxu2 %v3994_v37  ;;  %2367 = vmatpush.bf16.msra.mxu3 %v4122_v38  ;;  %v4271_v37 = vld [vmem:[#allocation7 + $0x48] sm:$0xf0]  ;;  %v4851_v38 = vld [vmem:[#allocation7 + $0xc4] sm:$0xf] }
 0x187   :  { %v4274_v57 = vor.u32 %v4835_v34, %v4271_v37  ;;  %v4874_v37 = vld [vmem:[#allocation7 + $0x174] sm:$0xf0] }
 0x189   :  { %2818 = vmatpush.bf16.msrb.mxu0 %v4262_v40  ;;  %2831 = vmatpush.bf16.msrb.mxu1 %v4326_v43  ;;  %v4335_v40 = vld [vmem:[#allocation7 + $0xc8] sm:$0xf0] }
 0x18a   :  { %2355 = vmatmul.bf16.vlgmr.msra.gmra.mxu2 %v5162_v58  ;;  %2368 = vmatmul.bf16.vlgmr.msra.gmra.mxu3 %v5164_v59  ;;  %v2123_v58 = vadd.f32 %v5207_v39, %v2110_v8  ;;  %v4238_v59 = vor.u32 %v4828_v5, %v4237_v33  ;;  %v4338_v52 = vor.u32 %v4851_v38, %v4335_v40  ;;  %v4255_v5 = vld [vmem:[#allocation7 + $0x28] sm:$0xf0]  ;;  %v4485_v38 = vld [vmem:[#allocation7 + $0x1f0] sm:$0xf] }
 0x18c   :  { %v2136_v29 = vadd.f32 %v5209_v23, %v2123_v58  ;;  %v4346_v23 = vor.u32 %v4853_v41, %v4343_v31  ;;  %v4322_v58 = vor.u32 %v4847_v24, %v4319_v6  ;;  %v4884_v24 = vld [vmem:[#allocation7 + $0x1c4] sm:$0xf0]  ;;  %v4389_v6 = vld [vmem:[#allocation7 + $0x130] sm:$0xf] }
 0x18d   :  { %2819 = vmatpush.bf16.msrb.mxu0 %v4254_v53  ;;  %2832 = vmatpush.bf16.msrb.mxu1 %v4318_v54  ;;  %v4833_v53 = vld [vmem:[#allocation7 + $0x34] sm:$0xf] }
 0x18e   :  { %v2148_v21 = vpop.f32.mrf.mxu2  ;;  %v2161_v39 = vpop.f32.mrf.mxu3  ;;  %v4266_v2 = vor.u32 %v4833_v53, %v4263_v60  ;;  %v4405_v60 = vld [vmem:[#allocation7 + $0x150] sm:$0xf] }
 0x18f   :  { %v2149_v30 = vadd.f32 %v2148_v21, %v2136_v29  ;;  %v4239_v29 = vld [vmem:[#allocation7 + $0x8] sm:$0xf0]  ;;  %v4843_v21 = vld [vmem:[#allocation7 + $0x84] sm:$0xf] }
 0x190   :  { %v4242_v48 = vor.u32 %v4827_v0, %v4239_v29  ;;  %v4437_v0 = vld [vmem:[#allocation7 + $0x190] sm:$0xf] }
 0x191   :  { %2820 = vmatpush.bf16.msrb.mxu0 %v4246_v4  ;;  %2833 = vmatpush.bf16.msrb.mxu1 %v4310_v32  ;;  %v2162_v14 = vadd.f32 %v2161_v39, %v2149_v30  ;;  %v4831_v4 = vld [vmem:[#allocation7 + $0x24] sm:$0xf]  ;;  %v4303_v39 = vld [vmem:[#allocation7 + $0x88] sm:$0xf0] }
 0x192   :  { %v4258_v63 = vor.u32 %v4831_v4, %v4255_v5  ;;  %v4306_v26 = vor.u32 %v4843_v21, %v4303_v39  ;;  %v4397_v4 = vld [vmem:[#allocation7 + $0x140] sm:$0xf]  ;;  %v4878_v21 = vld [vmem:[#allocation7 + $0x194] sm:$0xf0] }
 0x193   :  { %v2373_v35 = vpack.c.bf16 %v2162_v14, %v2058_v42  ;;  %v4438_v39 = vor.u32 %v4878_v21, %v4437_v0  ;;  %v4375_v0 = vld [vmem:[#allocation7 + $0x118] sm:$0xf0] }
 0x195   :  { %2821 = vmatpush.bf16.msrb.mxu0 %v4238_v59  ;;  %2834 = vmatpush.bf16.msrb.mxu1 %v4302_v11  ;;  %v2394_v43 = vunpack.c.l.bf16 %v2373_v35  ;;  %v2395_v44 = vunpack.c.h.bf16 %v2373_v35  ;;  %v2174_v45 = vpop.f32.mrf.mxu0  ;;  %v2187_v46 = vpop.f32.mrf.mxu1  ;;  %v4829_v59 = vld [vmem:[#allocation7 + $0x14] sm:$0xf] }
 0x196   :  { %v2188_v47 = vadd.f32 %v2187_v46, %v2174_v45  ;;  %v2150_v50 = vpop.f32.mrf.mxu2  ;;  %v2163_v51 = vpop.f32.mrf.mxu3  ;;  %v4250_v19 = vor.u32 %v4829_v59, %v4247_v13  ;;  %v4413_v45 = vld [vmem:[#allocation7 + $0x160] sm:$0xf]  ;;  %v4872_v46 = vld [vmem:[#allocation7 + $0x164] sm:$0xf0] }
 0x197   :  { %v2402_v54 = vadd.f32 %v2398_v36, %v2394_v43  ;;  %v2403_v55 = vadd.f32 %v2399_v28, %v2395_v44  ;;  %v4421_v28 = vld [vmem:[#allocation7 + $0x170] sm:$0xf]  ;;  %v4890_v43 = vld [vmem:[#allocation7 + $0x1f4] sm:$0xf0]  ;;  %v4864_v13 = vld [vmem:[#allocation7 + $0x124] sm:$0xf0] }
 0x198   :  { %v4422_v40 = vor.u32 %v4874_v37, %v4421_v28  ;;  %v4486_v44 = vor.u32 %v4890_v43, %v4485_v38  ;;  %v4871_v37 = vld [vmem:[#allocation7 + $0x164] sm:$0xf]  ;;  %v4415_v38 = vld [vmem:[#allocation7 + $0x168] sm:$0xf0] }
 0x199   :  { %2866 = vmatpush.bf16.msra.mxu0 %v4298_v15  ;;  %2879 = vmatpush.bf16.msra.mxu1 %v4362_v16  ;;  %v2406_v1 = vpack.c.bf16 %v2403_v55, %v2402_v54  ;;  %v4845_v15 = vld [vmem:[#allocation7 + $0x94] sm:$0xf]  ;;  %v4311_v16 = vld [vmem:[#allocation7 + $0x98] sm:$0xf0]  ;;  %v4418_v43 = vor.u32 %v4871_v37, %v4415_v38 }
 0x19a   :  { %v4314_v20 = vor.u32 %v4845_v15, %v4311_v16  ;;  %2840 = vmatpush.bf16.msrb.mxu2 %v4422_v40  ;;  %2853 = vmatpush.bf16.msrb.mxu3 %v4486_v44  ;;  %v4445_v15 = vld [vmem:[#allocation7 + $0x1a0] sm:$0xf]  ;;  %v4880_v16 = vld [vmem:[#allocation7 + $0x1a4] sm:$0xf0]  ;;  %v4887_v40 = vld [vmem:[#allocation7 + $0x1e4] sm:$0xf] }
 0x19b   :  { %v2408_v32 = vunpack.c.l.bf16 %v2406_v1  ;;  %v2409_v33 = vunpack.c.h.bf16 %v2406_v1  ;;  %v4406_v1 = vor.u32 %v4870_v61, %v4405_v60  ;;  %v4479_v44 = vld [vmem:[#allocation7 + $0x1e8] sm:$0xf0]  ;;  %v4471_v61 = vld [vmem:[#allocation7 + $0x1d8] sm:$0xf0] }
 0x19d   :  { %2867 = vmatpush.bf16.msra.mxu0 %v4290_v49  ;;  %2880 = vmatpush.bf16.msra.mxu1 %v4354_v27  ;;  %v2176_v7 = vpop.f32.mrf.mxu0  ;;  %v2189_v8 = vpop.f32.mrf.mxu1  ;;  %v2412_v9 = vmul.f32 0.010009766, %v2408_v32  ;;  %v2413_v10 = vmul.f32 0.010009766, %v2409_v33 }
 0x19e   :  { %v4866_v7 = vld [vmem:[#allocation7 + $0x134] sm:$0xf0] }
 0x19f   :  { %v2422_v11 = vmax.f32 %v2408_v32, %v2412_v9  ;;  %v2423_v12 = vmax.f32 %v2409_v33, %v2413_v10  ;;  %v4868_v32 = vld [vmem:[#allocation7 + $0x144] sm:$0xf0]  ;;  %v4461_v33 = vld [vmem:[#allocation7 + $0x1c0] sm:$0xf]  ;;  %v4390_v59 = vor.u32 %v4866_v7, %v4389_v6  ;;  %v4865_v7 = vld [vmem:[#allocation7 + $0x134] sm:$0xf] }
 0x1a0   :  { %v4398_v5 = vor.u32 %v4868_v32, %v4397_v4  ;;  %v4462_v10 = vor.u32 %v4884_v24, %v4461_v33  ;;  %v4463_v4 = vld [vmem:[#allocation7 + $0x1c8] sm:$0xf0] }
 0x1a1   :  { %2868 = vmatpush.bf16.msra.mxu0 %v4282_v56  ;;  %2881 = vmatpush.bf16.msra.mxu1 %v4346_v23  ;;  %v2426_v17 = vpack.c.bf16 %v2422_v11, %v2422_v11  ;;  %v2427_v18 = vpack.c.bf16 %v2423_v12, %v2423_v12  ;;  %v4381_v12 = vld [vmem:[#allocation7 + $0x120] sm:$0xf] }
 0x1a3   :  { %2822 = vmatmul.bf16.vlgmr.msrb.gmra.mxu0 %v2426_v17  ;;  %2835 = vmatmul.bf16.vlgmr.msrb.gmra.mxu1 %v2427_v18 }
 0x1a5   :  { %2869 = vmatpush.bf16.msra.mxu0 %v4274_v57  ;;  %2882 = vmatpush.bf16.msra.mxu1 %v4338_v52  ;;  %v4414_v57 = vor.u32 %v4872_v46, %v4413_v45  ;;  %v4888_v52 = vld [vmem:[#allocation7 + $0x1e4] sm:$0xf0] }
 0x1a7   :  { %2841 = vmatpush.bf16.msrb.mxu2 %v4414_v57 }
 0x1a9   :  { %2870 = vmatpush.bf16.msra.mxu0 %v4266_v2  ;;  %2883 = vmatpush.bf16.msra.mxu1 %v4330_v3  ;;  %v4886_v2 = vld [vmem:[#allocation7 + $0x1d4] sm:$0xf0] }
 0x1aa   :  { %v4470_v3 = vor.u32 %v4886_v2, %v4469_v62  ;;  %v4867_v62 = vld [vmem:[#allocation7 + $0x144] sm:$0xf] }
 0x1ab   :  { %2842 = vmatpush.bf16.msrb.mxu2 %v4406_v1  ;;  %v4399_v1 = vld [vmem:[#allocation7 + $0x148] sm:$0xf0] }
 0x1ac   :  { %v4402_v32 = vor.u32 %v4867_v62, %v4399_v1 }
 0x1ad   :  { %2871 = vmatpush.bf16.msra.mxu0 %v4258_v63  ;;  %2884 = vmatpush.bf16.msra.mxu1 %v4322_v58  ;;  %v4453_v63 = vld [vmem:[#allocation7 + $0x1b0] sm:$0xf]  ;;  %v4882_v58 = vld [vmem:[#allocation7 + $0x1b4] sm:$0xf0] }
 0x1ae   :  { %v2200_v49 = vpop.f32.mrf.mxu2  ;;  %v2213_v27 = vpop.f32.mrf.mxu3  ;;  %v4454_v11 = vor.u32 %v4882_v58, %v4453_v63  ;;  %v4455_v63 = vld [vmem:[#allocation7 + $0x1b8] sm:$0xf0] }
 0x1af   :  { %v2201_v25 = vadd.f32 %v2200_v49, %v2188_v47  ;;  %v4477_v47 = vld [vmem:[#allocation7 + $0x1e0] sm:$0xf]  ;;  %2843 = vmatpush.bf16.msrb.mxu2 %v4398_v5 }
 0x1b0   :  { %v4478_v55 = vor.u32 %v4888_v52, %v4477_v47  ;;  %v4365_v49 = vld [vmem:[#allocation7 + $0x100] sm:$0xf]  ;;  %v4482_v47 = vor.u32 %v4887_v40, %v4479_v44 }
 0x1b1   :  { %2872 = vmatpush.bf16.msra.mxu0 %v4250_v19  ;;  %2885 = vmatpush.bf16.msra.mxu1 %v4314_v20  ;;  %v2214_v30 = vadd.f32 %v2213_v27, %v2201_v25  ;;  %v4373_v19 = vld [vmem:[#allocation7 + $0x110] sm:$0xf]  ;;  %v4862_v20 = vld [vmem:[#allocation7 + $0x114] sm:$0xf0]  ;;  %v4860_v27 = vld [vmem:[#allocation7 + $0x104] sm:$0xf0] }
 0x1b2   :  { %2854 = vmatpush.bf16.msrb.mxu3 %v4478_v55  ;;  %v4374_v29 = vor.u32 %v4862_v20, %v4373_v19  ;;  %v4429_v25 = vld [vmem:[#allocation7 + $0x180] sm:$0xf]  ;;  %v4885_v55 = vld [vmem:[#allocation7 + $0x1d4] sm:$0xf] }
 0x1b3   :  { %2844 = vmatpush.bf16.msrb.mxu2 %v4390_v59  ;;  %v4474_v2 = vor.u32 %v4885_v55, %v4471_v61  ;;  %v4861_v20 = vld [vmem:[#allocation7 + $0x114] sm:$0xf] }
 0x1b4   :  { %v4378_v21 = vor.u32 %v4861_v20, %v4375_v0  ;;  %v4892_v20 = vld [vmem:[#allocation8 + $0x8] sm:$0xff] }
 0x1b5   :  { %2873 = vmatpush.bf16.msra.mxu0 %v4242_v48  ;;  %2886 = vmatpush.bf16.msra.mxu1 %v4306_v26  ;;  %v2226_v22 = vpop.f32.mrf.mxu0  ;;  %v2239_v41 = vpop.f32.mrf.mxu1  ;;  %v4900_v0 = vld [vmem:[#allocation8 + $0x48] sm:$0xff] }
 0x1b6   :  { %v2227_v31 = vadd.f32 %v2226_v22, %v2214_v30  ;;  %v2202_v42 = vpop.f32.mrf.mxu2  ;;  %v2215_v14 = vpop.f32.mrf.mxu3  ;;  %2855 = vmatpush.bf16.msrb.mxu3 %v4470_v3  ;;  %v4876_v30 = vld [vmem:[#allocation7 + $0x184] sm:$0xf0]  ;;  %v4366_v22 = vor.u32 %v4860_v27, %v4365_v49  ;;  %v4883_v3 = vld [vmem:[#allocation7 + $0x1c4] sm:$0xf]  ;;  %v4367_v49 = vld [vmem:[#allocation7 + $0x108] sm:$0xf0] }
 0x1b7   :  { %v4423_v42 = vld [vmem:[#allocation7 + $0x178] sm:$0xf0]  ;;  %v4889_v14 = vld [vmem:[#allocation7 + $0x1f4] sm:$0xf]  ;;  %v4466_v33 = vor.u32 %v4883_v3, %v4463_v4 }
 0x1b8   :  { %2874 = vmatmul.bf16.vlgmr.msra.gmra.mxu0 %v2426_v17  ;;  %2887 = vmatmul.bf16.vlgmr.msra.gmra.mxu1 %v2427_v18  ;;  %v5222_v56 = vadd.f32 %v2239_v41, %v2227_v31  ;;  %v4382_v17 = vor.u32 %v4864_v13, %v4381_v12  ;;  %v4446_v18 = vor.u32 %v4880_v16, %v4445_v15  ;;  %v4873_v31 = vld [vmem:[#allocation7 + $0x174] sm:$0xf]  ;;  %v4383_v12 = vld [vmem:[#allocation7 + $0x128] sm:$0xf0]  ;;  %v4879_v13 = vld [vmem:[#allocation7 + $0x1a4] sm:$0xf] }
 0x1b9   :  { %v4430_v41 = vor.u32 %v4876_v30, %v4429_v25  ;;  %v4447_v15 = vld [vmem:[#allocation7 + $0x1a8] sm:$0xf0] }
 0x1ba   :  { %2856 = vmatpush.bf16.msrb.mxu3 %v4462_v10  ;;  %2845 = vmatpush.bf16.msrb.mxu2 %v4382_v17  ;;  %v4450_v17 = vor.u32 %v4879_v13, %v4447_v15  ;;  %v4904_v13 = vld [vmem:[#allocation8 + $0x68] sm:$0xff]  ;;  %v2919_v15 = vld [vmem:[%s5258_s6] sm:$0x3] }
 0x1bd   :  { %v2228_v23 = vpop.f32.mrf.mxu0  ;;  %v2241_v34 = vpop.f32.mrf.mxu1 }
 0x1be   :  { %2857 = vmatpush.bf16.msrb.mxu3 %v4454_v11  ;;  %2846 = vmatpush.bf16.msrb.mxu2 %v4374_v29  ;;  %v4426_v23 = vor.u32 %v4873_v31, %v4423_v42  ;;  %v4487_v34 = vld [vmem:[#allocation7 + $0x1f8] sm:$0xf0]  ;;  %v4863_v11 = vld [vmem:[#allocation7 + $0x124] sm:$0xf]  ;;  %v4877_v29 = vld [vmem:[#allocation7 + $0x194] sm:$0xf] }
 0x1bf   :  { %v4490_v28 = vor.u32 %v4889_v14, %v4487_v34  ;;  %v4386_v16 = vor.u32 %v4863_v11, %v4383_v12  ;;  %v4905_v11 = vld [vmem:[#allocation8 + $0x70] sm:$0xff]  ;;  %v4896_v12 = vld [vmem:[#allocation8 + $0x28] sm:$0xff] }
 0x1c2   :  { %2858 = vmatpush.bf16.msrb.mxu3 %v4446_v18  ;;  %2847 = vmatpush.bf16.msrb.mxu2 %v4366_v22  ;;  %v4875_v22 = vld [vmem:[#allocation7 + $0x184] sm:$0xf] }
 0x1c6   :  { %2859 = vmatpush.bf16.msrb.mxu3 %v4438_v39  ;;  %2892 = vmatpush.bf16.msra.mxu2 %v4426_v23  ;;  %v4439_v39 = vld [vmem:[#allocation7 + $0x198] sm:$0xf0] }
 0x1c7   :  { %v4442_v30 = vor.u32 %v4877_v29, %v4439_v39  ;;  %v4891_v29 = vld [vmem:[#allocation8] sm:$0xff] }
 0x1ca   :  { %2860 = vmatpush.bf16.msrb.mxu3 %v4430_v41  ;;  %2893 = vmatpush.bf16.msra.mxu2 %v4418_v43  ;;  %v4431_v41 = vld [vmem:[#allocation7 + $0x188] sm:$0xf0] }
 0x1cb   :  { %v4434_v34 = vor.u32 %v4875_v22, %v4431_v41 }
 0x1ce   :  { %v5224_v35 = vpop.f32.mrf.mxu2  ;;  %v5226_v36 = vpop.f32.mrf.mxu3  ;;  %2905 = vmatpush.bf16.msra.mxu3 %v4490_v28 }
 0x1d2   :  { %2906 = vmatpush.bf16.msra.mxu3 %v4482_v47 }
 0x1d5   :  { %v5228_v50 = vpop.f32.mrf.mxu0  ;;  %v5230_v51 = vpop.f32.mrf.mxu1 }
 0x1d6   :  { %v2254_v53 = vpop.f32.mrf.mxu2  ;;  %v2267_v54 = vpop.f32.mrf.mxu3  ;;  %2907 = vmatpush.bf16.msra.mxu3 %v4474_v2  ;;  %v2292_v6 = vadd.f32 %v5230_v51, %v5228_v50  ;;  %v2380_v50 = vld [vmem:[#allocation1 + $0x12] sm:$0xff]  ;;  %v2381_v51 = vld [vmem:[#allocation1 + $0x1b] sm:$0xff] }
 0x1d7   :  { %v4869_v53 = vld [vmem:[#allocation7 + $0x154] sm:$0xf]  ;;  %v4407_v54 = vld [vmem:[#allocation7 + $0x158] sm:$0xf0]  ;;  %v2388_v27 = vpack.i.b16 %v2380_v50, %v2380_v50  ;;  %v2391_v25 = vpack.i.b16 %v2381_v51, %v2381_v51  ;;  %2921 = vst [vmem:[#allocation1] ss:$9 sm:$0xff] %v2919_v15 }
 0x1d8   :  { %v4410_v60 = vor.u32 %v4869_v53, %v4407_v54  ;;  %v4902_v50 = vld [vmem:[#allocation8 + $0x58] sm:$0xff]  ;;  %v4893_v51 = vld [vmem:[#allocation8 + $0x10] sm:$0xff] }
 0x1d9   :  { %v2390_v37 = vperm.slane %v2388_v27, 0  ;;  %v2393_v38 = vperm.slane %v2391_v25, 0 }
 0x1da   :  { %2894 = vmatpush.bf16.msra.mxu2 %v4410_v60  ;;  %2908 = vmatpush.bf16.msra.mxu3 %v4466_v33 }
 0x1db   :  { %v2401_v47 = vunpack.c.l.bf16 %v2393_v38 }
 0x1dd   :  { %v2280_v8 = vpop.f32.mrf.mxu0  ;;  %v2293_v9 = vpop.f32.mrf.mxu1 }
 0x1de   :  { %2895 = vmatpush.bf16.msra.mxu2 %v4402_v32  ;;  %v4391_v8 = vld [vmem:[#allocation7 + $0x138] sm:$0xf0]  ;;  %v4881_v9 = vld [vmem:[#allocation7 + $0x1b4] sm:$0xf] }
 0x1df   :  { %v4394_v10 = vor.u32 %v4865_v7, %v4391_v8  ;;  %v4458_v59 = vor.u32 %v4881_v9, %v4455_v63  ;;  %v4898_v63 = vld [vmem:[#allocation8 + $0x38] sm:$0xff] }
 0x1e0   :  { %3076 = vmatpush.bf16.msrb.mxu0 %v4898_v63  ;;  %v2922_v25 = vld [vmem:[#allocation1] sm:$0xff] }
 0x1e1   :  { %2909 = vmatpush.bf16.msra.mxu3 %v4458_v59  ;;  %v4897_v59 = vld [vmem:[#allocation8 + $0x30] sm:$0xff]  ;;  %v2924_v22 = vpack.i.b16 %v2922_v25, %v2922_v25 }
 0x1e2   :  { %2896 = vmatpush.bf16.msra.mxu2 %v4394_v10  ;;  %v3118_v63 = vld [vmem:[%s5261_s9] sm:$0x1] }
 0x1e4   :  { %3077 = vmatpush.bf16.msrb.mxu0 %v4897_v59 }
 0x1e5   :  { %2910 = vmatpush.bf16.msra.mxu3 %v4450_v17  ;;  %v4903_v17 = vld [vmem:[#allocation8 + $0x60] sm:$0xff] }
 0x1e6   :  { %2897 = vmatpush.bf16.msra.mxu2 %v4386_v16  ;;  %v4895_v16 = vld [vmem:[#allocation8 + $0x20] sm:$0xff] }
 0x1e8   :  { %3078 = vmatpush.bf16.msrb.mxu0 %v4896_v12 }
 0x1e9   :  { %2911 = vmatpush.bf16.msra.mxu3 %v4442_v30  ;;  %v2923_v30 = vld [vmem:[#allocation1 + $0x9] sm:$0xff] }
 0x1ea   :  { %2898 = vmatpush.bf16.msra.mxu2 %v4378_v21  ;;  %v4899_v21 = vld [vmem:[#allocation8 + $0x40] sm:$0xff]  ;;  %v2927_v41 = vpack.i.b16 %v2923_v30, %v2923_v30 }
 0x1ec   :  { %3079 = vmatpush.bf16.msrb.mxu0 %v4895_v16 }
 0x1ed   :  { %2912 = vmatpush.bf16.msra.mxu3 %v4434_v34  ;;  %v2929_v34 = vperm.slane %v2927_v41, 0 }
 0x1ee   :  { %v2304_v48 = vpop.f32.mrf.mxu2  ;;  %v5232_v26 = vpop.f32.mrf.mxu3 }
 0x1ef   :  { %v2305_v58 = vadd.f32 %v2304_v48, %v2292_v6  ;;  %v4859_v48 = vld [vmem:[#allocation7 + $0x104] sm:$0xf] }
 0x1f0   :  { %v4370_v42 = vor.u32 %v4859_v48, %v4367_v49 }
 0x1f1   :  { %v2318_v18 = vadd.f32 %v5232_v26, %v2305_v58  ;;  %v2253_v26 = vadd.f32 %v5224_v35, %v5222_v56  ;;  %v4906_v58 = vld [vmem:[#allocation8 + $0x78] sm:$0xff] }
 0x1f2   :  { %2899 = vmatpush.bf16.msra.mxu2 %v4370_v42  ;;  %3089 = vmatpush.bf16.msrb.mxu1 %v4906_v58 }
 0x1f3   :  { %v2266_v40 = vadd.f32 %v5226_v36, %v2253_v26 }
 0x1f5   :  { %v2330_v45 = vpop.f32.mrf.mxu0  ;;  %v2343_v46 = vpop.f32.mrf.mxu1 }
 0x1f6   :  { %v2306_v57 = vpop.f32.mrf.mxu2  ;;  %v2319_v52 = vpop.f32.mrf.mxu3  ;;  %v2331_v19 = vadd.f32 %v2330_v45, %v2318_v18  ;;  %v2400_v45 = vunpack.c.l.bf16 %v2390_v37  ;;  %3090 = vmatpush.bf16.msrb.mxu1 %v4905_v11  ;;  %v4894_v18 = vld [vmem:[#allocation8 + $0x18] sm:$0xff]  ;;  %v3119_v11 = vunpack.c.l.bf16 %v3118_v63 }
 0x1f7   :  { %3080 = vmatpush.bf16.msrb.mxu0 %v4894_v18  ;;  %v4919_v18 = vld [vmem:[#allocation2] ss:$0 sm:$0xff] }
 0x1f8   :  { %v2344_v31 = vadd.f32 %v2343_v46, %v2331_v19  ;;  %v4901_v19 = vld [vmem:[#allocation8 + $0x50] sm:$0xff]  ;;  %v3121_v15 = vperm.slane %v3119_v11, 0 }
 0x1fa   :  { %3091 = vmatpush.bf16.msrb.mxu1 %v4904_v13 }
 0x1fb   :  { %3081 = vmatpush.bf16.msrb.mxu0 %v4893_v51 }
 0x1fd   :  { %v2332_v5 = vpop.f32.mrf.mxu0  ;;  %v2345_v24 = vpop.f32.mrf.mxu1 }
 0x1fe   :  { %3092 = vmatpush.bf16.msrb.mxu1 %v4903_v17 }
 0x1ff   :  { %3082 = vmatpush.bf16.msrb.mxu0 %v4892_v20 }
 0x202   :  { %3093 = vmatpush.bf16.msrb.mxu1 %v4902_v50 }
 0x203   :  { %3083 = vmatpush.bf16.msrb.mxu0 %v4891_v29 }
 0x206   :  { %3094 = vmatpush.bf16.msrb.mxu1 %v4901_v19 }
 0x20a   :  { %3095 = vmatpush.bf16.msrb.mxu1 %v4900_v0 }
 0x20d   :  { %v2356_v14 = vpop.f32.mrf.mxu2  ;;  %v2369_v23 = vpop.f32.mrf.mxu3 }
 0x20e   :  { %v2357_v28 = vadd.f32 %v2356_v14, %v2344_v31  ;;  %3096 = vmatpush.bf16.msrb.mxu1 %v4899_v21 }
 0x210   :  { %v2370_v43 = vadd.f32 %v2369_v23, %v2357_v28  ;;  %v2926_v23 = vperm.slane %v2924_v22, 0 }
 0x212   :  { %v2374_v44 = vpack.c.bf16 %v2370_v43, %v2266_v40  ;;  %v2932_v40 = vunpack.c.l.bf16 %v2926_v23  ;;  %v2933_v43 = vunpack.c.l.bf16 %v2929_v34 }
 0x214   :  { %v2396_v57 = vunpack.c.l.bf16 %v2374_v44  ;;  %v2397_v56 = vunpack.c.h.bf16 %v2374_v44 }
 0x215   :  { %v2358_v35 = vpop.f32.mrf.mxu2  ;;  %v2371_v46 = vpop.f32.mrf.mxu3 }
 0x216   :  { %v2404_v52 = vadd.f32 %v2400_v45, %v2396_v57  ;;  %v2405_v53 = vadd.f32 %v2401_v47, %v2397_v56 }
 0x218   :  { %v2407_v54 = vpack.c.bf16 %v2405_v53, %v2404_v52 }
 0x21a   :  { %v2410_v55 = vunpack.c.l.bf16 %v2407_v54  ;;  %v2411_v60 = vunpack.c.h.bf16 %v2407_v54 }
 0x21c   :  { %v2414_v61 = vmul.f32 0.010009766, %v2410_v55  ;;  %v2415_v62 = vmul.f32 0.010009766, %v2411_v60 }
 0x21e   :  { %v2424_v1 = vmax.f32 %v2410_v55, %v2414_v61  ;;  %v2425_v2 = vmax.f32 %v2411_v60, %v2415_v62 }
 0x220   :  { %v2428_v36 = vpack.c.bf16 %v2424_v1, %v2424_v1  ;;  %v2429_v3 = vpack.c.bf16 %v2425_v2, %v2425_v2  ;;  %v2823_v4 = vpop.f32.mrf.mxu0  ;;  %v2836_v32 = vpop.f32.mrf.mxu1  ;;  %v3103_v2 = vld [vmem:[%s5260_s8] sm:$0x1] }
 0x221   :  { %v2837_v33 = vadd.f32 %v2836_v32, %v2823_v4 }
 0x222   :  { %2848 = vmatmul.bf16.vlgmr.msrb.gmra.mxu2 %v2428_v36  ;;  %2861 = vmatmul.bf16.vlgmr.msrb.gmra.mxu3 %v2429_v3 }
 0x228   :  { %v2825_v5 = vpop.f32.mrf.mxu0  ;;  %v2838_v24 = vpop.f32.mrf.mxu1 }
 0x232   :  { %2900 = vmatmul.bf16.vlgmr.msra.gmra.mxu2 %v2428_v36  ;;  %2913 = vmatmul.bf16.vlgmr.msra.gmra.mxu3 %v2429_v3  ;;  %v3105_v36 = vpack.i.b16 %v3103_v2, %v3103_v2 }
 0x234   :  { %v3107_v3 = vperm.slane %v3105_v36, 0 }
 0x235   :  { %v2875_v6 = vpop.f32.mrf.mxu0  ;;  %v2888_v7 = vpop.f32.mrf.mxu1 }
 0x236   :  { %v2889_v8 = vadd.f32 %v2888_v7, %v2875_v6  ;;  %v3109_v24 = vunpack.c.l.bf16 %v3107_v3 }
 0x23d   :  { %v2877_v9 = vpop.f32.mrf.mxu0  ;;  %v2890_v10 = vpop.f32.mrf.mxu1 }
 0x2a5   :  { %v2849_v39 = vpop.f32.mrf.mxu2  ;;  %v2862_v48 = vpop.f32.mrf.mxu3 }
 0x2a6   :  { %v2850_v26 = vadd.f32 %v2849_v39, %v2837_v33 }
 0x2a8   :  { %v2863_v28 = vadd.f32 %v2862_v48, %v2850_v26 }
 0x2ad   :  { %v2851_v49 = vpop.f32.mrf.mxu2  ;;  %v2864_v27 = vpop.f32.mrf.mxu3 }
 0x2b5   :  { %v2901_v31 = vpop.f32.mrf.mxu2  ;;  %v2914_v42 = vpop.f32.mrf.mxu3 }
 0x2b6   :  { %v2902_v14 = vadd.f32 %v2901_v31, %v2889_v8 }
 0x2b8   :  { %v2915_v37 = vadd.f32 %v2914_v42, %v2902_v14 }
 0x2ba   :  { %v2918_v38 = vpack.c.bf16 %v2915_v37, %v2863_v28 }
 0x2bc   :  { %v2930_v44 = vunpack.c.l.bf16 %v2918_v38  ;;  %v2931_v45 = vunpack.c.h.bf16 %v2918_v38 }
 0x2bd   :  { %v2903_v47 = vpop.f32.mrf.mxu2  ;;  %v2916_v57 = vpop.f32.mrf.mxu3 }
 0x2be   :  { %v2934_v56 = vadd.f32 %v2932_v40, %v2930_v44  ;;  %v2935_v35 = vadd.f32 %v2933_v43, %v2931_v45 }
 0x2c0   :  { %v2936_v46 = vpack.c.bf16 %v2935_v35, %v2934_v56 }
 0x2c2   :  { %v2937_v52 = vunpack.c.l.bf16 %v2936_v46  ;;  %v2938_v53 = vunpack.c.h.bf16 %v2936_v46 }
 0x2c4   :  { %v2939_v54 = vmul.f32 0.010009766, %v2937_v52  ;;  %v2940_v55 = vmul.f32 0.010009766, %v2938_v53 }
 0x2c6   :  { %v2944_v60 = vmax.f32 %v2937_v52, %v2939_v54  ;;  %v2945_v61 = vmax.f32 %v2938_v53, %v2940_v55 }
 0x2c8   :  { %v2946_v62 = vpack.c.bf16 %v2944_v60, %v2944_v60  ;;  %v2947_v1 = vpack.c.bf16 %v2945_v61, %v2945_v61 }
 0x2ca   :  { %3084 = vmatmul.bf16.vlgmr.msrb.gmra.mxu0 %v2946_v62  ;;  %3097 = vmatmul.bf16.vlgmr.msrb.gmra.mxu1 %v2947_v1 }
 0x347   :  { %v3085_v4 = vpop.f32.mrf.mxu0  ;;  %v3098_v32 = vpop.f32.mrf.mxu1 }
 0x348   :  { %v3099_v33 = vadd.f32 %v3098_v32, %v3085_v4 }
 0x34a   :  { %v3102_v5 = vpack.c.bf16 %v3099_v33, %v3099_v33 }
 0x34c   :  { %v3108_v6 = vunpack.c.l.bf16 %v3102_v5 }
 0x34e   :  { %v3110_v7 = vadd.f32 %v3109_v24, %v3108_v6 }
 0x34f   :  { %v3087_v8 = vpop.f32.mrf.mxu0  ;;  %v3100_v9 = vpop.f32.mrf.mxu1 }
 0x350   :  { %v3111_v10 = vpack.c.bf16 %v3110_v7, %v3110_v7 }
 0x352   :  { %v3112_v58 = vunpack.c.l.bf16 %v3111_v10 }
 0x354   :  { %v3113_v59 = vmul.f32 0.010009766, %v3112_v58 }
 0x356   :  { %v3116_v12 = vmax.f32 %v3112_v58, %v3113_v59 }
 0x358   :  { %v3117_v13 = vpack.c.bf16 %v3116_v12, %v3116_v12 }
 0x35a   :  { %v3120_v16 = vunpack.c.l.bf16 %v3117_v13 }
 0x35c   :  { %v3122_v17 = vmul.f32 %v3121_v15, %v3120_v16 }
 0x35e   :  { %3123 = vadd.xlane.f32.xlu0 %v3122_v17 }
 0x3d1   :  { %v3124_v50 = vpop.xlane.xlu0 %3123 }
 0x3d2   :  { %v3129_v51 = vadd.f32 %v4919_v18, %v3124_v50 }
 0x3d4   :  { %3131 = vst.msk [vmem:[%s5263_s11] sm:$0xff] %vm3130_vm1, %v3129_v51 }
 0x3d5   :  { %3136 = vsyncpa [#allocation4], 1 }
 0x3d6   :  { %3137 = vsyncpa [#allocation6], 1 }
 0x3d7   :  { %3138 = vsyncpa [#allocation9], 1 }

</bundles_post_ra>
